<compile_context>
chip_gen: v7x
topology: tpu7x:2x2x1
jax: 0.10.0
libtpu: 0.0.40
codegen_flags: <defaults>
</compile_context>

<pallas_src>
import functools

import jax
import jax.numpy as jnp
from jax.experimental import pallas as pl
from jax.experimental.pallas import tpu as pltpu


# ---------------------------------------------------------------------------
# Pass 1: ContextBlock chain  ->  per-image channel-add vector A  (B, 1, C)
# ---------------------------------------------------------------------------
def context_chain_kernel(x_ref, wm_ref, bm_ref, w1_ref, b1_ref, lnw_ref, lnb_ref,
                         w2_ref, b2_ref, add_ref, m_sc, s_sc, num_sc):
    t = pl.program_id(1)
    depth = wm_ref.shape[0]
    C = x_ref.shape[2]

    @pl.when(t == 0)
    def _():
        m_sc[...] = jnp.full_like(m_sc, -jnp.inf)
        s_sc[...] = jnp.zeros_like(s_sc)
        num_sc[...] = jnp.zeros_like(num_sc)

    x = x_ref[0]                                                  # (TILE, C) f32

    # Online softmax-attention pooling over row tiles; one accumulator triple per block.
    for d in range(depth):
        # conv_mask logits as a VPU multiply + lane reduce (keeps the (TILE,C)@(C,1)
        # fill/drain matmul off the MXU).
        logit = jnp.sum(x * wm_ref[d], axis=1, keepdims=True) + bm_ref[d]   # (TILE, 1)
        m_old = m_sc[d]                                           # (1, 1)
        m_new = jnp.maximum(m_old, jnp.max(logit, axis=0, keepdims=True))
        scale = jnp.exp(m_old - m_new)
        e = jnp.exp(logit - m_new)                                # (TILE, 1)
        s_sc[d] = s_sc[d] * scale + jnp.sum(e, axis=0, keepdims=True)
        num_sc[d] = num_sc[d] * scale + jnp.sum(x * e, axis=0, keepdims=True)
        m_sc[d] = m_new

    @pl.when(t == pl.num_programs(1) - 1)
    def _():
        # channel_add chain on tiny (1,C)/(1,P) vectors, once per image, exact f32.
        add_tot = jnp.zeros((1, C), jnp.float32)
        for d in range(depth):
            ctx = num_sc[d] / s_sc[d] + add_tot                   # pooled context of x_d
            h = jnp.dot(ctx, w1_ref[d], preferred_element_type=jnp.float32) + b1_ref[d]
            mu = jnp.mean(h, axis=-1, keepdims=True)
            var = jnp.mean((h - mu) ** 2, axis=-1, keepdims=True)
            h = (h - mu) * jax.lax.rsqrt(var + 1e-5)
            h = h * lnw_ref[d] + lnb_ref[d]
            h = jnp.maximum(h, 0.0)
            add_tot = add_tot + (jnp.dot(h, w2_ref[d], preferred_element_type=jnp.float32)
                                 + b2_ref[d])
        add_ref[0] = add_tot


# ---------------------------------------------------------------------------
# Pass 2: UpSample (scale 2), tiled over image rows with a 1-row halo each side
# ---------------------------------------------------------------------------
def upsample_kernel(above_ref, x_ref, below_ref, add_ref,
                    wp1_ref, ap_ref, wpt_ref, wb1_ref, bb1_ref, ab_ref, wbc_ref,
                    out_ref, *, W, mix_dtype):
    TILE = x_ref.shape[1]
    C = x_ref.shape[2]
    Ch = C // 2

    add = add_ref[0]                                              # (1, C) channel-add vector
    xt = x_ref[0] + add                                           # post-ContextBlock tile
    # tile + 1-row halo (edge clamp already applied by the halo index_maps)
    xa = jnp.concatenate([above_ref[0] + add, xt, below_ref[0] + add], axis=0)

    a_p = ap_ref[...]                                             # PReLU slopes (1,1)
    a_b = ab_ref[...]

    # ---- pixel-shuffle branch (tail 1x1 convs folded into wpt) ----
    p_all = jnp.dot(xt.astype(jnp.bfloat16), wp1_ref[...],
                    preferred_element_type=jnp.float32)           # (TILE, 2C) phase-major
    p_all = jnp.where(p_all >= 0.0, p_all, a_p * p_all)
    if wpt_ref.shape[0] == 2 * C:
        # small Ch: one lane-dense block-diagonal matmul
        xp = jnp.dot(p_all.astype(jnp.bfloat16), wpt_ref[...],
                     preferred_element_type=jnp.float32)          # (TILE, 2C)
    else:
        # large Ch (4*Ch > 256): per-phase matmuls, no 75%-zero kron weight
        parts = []
        for k in range(4):
            pk = p_all[:, k * Ch:(k + 1) * Ch].astype(jnp.bfloat16)
            parts.append(jnp.dot(pk, wpt_ref[...], preferred_element_type=jnp.float32))
        xp = jnp.concatenate(parts, axis=-1)

    # ---- bilinear branch (tail 1x1 convs folded into wbc), on tile + halo ----
    b_pre = jnp.dot(xa.astype(jnp.bfloat16), wb1_ref[...],
                    preferred_element_type=jnp.float32) + bb1_ref[...]
    b_pre = jnp.where(b_pre >= 0.0, b_pre, a_b * b_pre)
    yb = jnp.dot(b_pre.astype(jnp.bfloat16), wbc_ref[...],
                 preferred_element_type=jnp.float32)              # (TILE + 2W, Ch)

    up = yb[:TILE]                 # input row h-1 (halo, edge-clamped)
    ce = yb[W:TILE + W]            # input row h
    dn = yb[2 * W:2 * W + TILE]    # input row h+1
    r_e = 0.25 * up + 0.75 * ce    # output rows 2h     (align_corners=False)
    r_o = 0.75 * ce + 0.25 * dn    # output rows 2h+1

    # w==0 / w==W-1 clamp masks, 1 lane wide (no full-width iota)
    wcol = jax.lax.broadcasted_iota(jnp.int32, (TILE, 1), 0) % W
    is_w0 = wcol == 0
    is_wl = wcol == (W - 1)

    def col_phases(r):
        # left/right pixel neighbours via XLU sublane rolls (f32 for portability);
        # rolls wrap across row boundaries, the masks restore the edge clamp.
        lft = jnp.where(is_w0, r, pltpu.roll(r, 1, axis=0))
        rgt = jnp.where(is_wl, r, pltpu.roll(r, TILE - 1, axis=0))
        r_m = r.astype(mix_dtype)
        l_m = lft.astype(mix_dtype)
        g_m = rgt.astype(mix_dtype)
        return 0.25 * l_m + 0.75 * r_m, 0.75 * r_m + 0.25 * g_m

    ee, eo = col_phases(r_e)
    oe, oo = col_phases(r_o)
    # TODO(synk): when Ch % 128 == 0, write per-phase lane slices instead of this concat.
    xb = jnp.concatenate([ee, eo, oe, oo], axis=-1)               # (TILE, 4*Ch), phase k=2i+j

    out_ref[0] = (xp + xb.astype(jnp.float32)).astype(out_ref.dtype)


# ---------------------------------------------------------------------------
# Parameters (synthetic), folds, wrapper
# ---------------------------------------------------------------------------
def build_params(key, dim, depth, ratio):
    C = dim
    P = int(dim * ratio)
    Ch = C // 2
    ks = jax.random.split(key, 16)

    def rnd(k, shape, scale=0.3):
        return jax.random.normal(k, shape, jnp.float32) * scale

    return {
        # ContextBlock params, stacked over depth
        "wm":  rnd(ks[0], (depth, C, 1)),
        "bm":  rnd(ks[1], (depth, 1, 1), 0.1),
        "w1":  rnd(ks[2], (depth, C, P)),
        "b1":  rnd(ks[3], (depth, 1, P), 0.1),
        "lnw": jnp.ones((depth, 1, P), jnp.float32),
        "lnb": jnp.zeros((depth, 1, P), jnp.float32),
        # NOTE: real module zero-inits this last conv; random here so compute is non-trivial
        "w2":  rnd(ks[4], (depth, P, C)),
        "b2":  rnd(ks[5], (depth, 1, C), 0.1),
        # UpSample params (channels-last matrices)
        "wp1": rnd(ks[6], (C, 2 * C)),                  # up_p conv1 (C -> 2C), no bias
        "ap":  jnp.full((1, 1), 0.25, jnp.float32),     # PReLU default scalar slope
        "wp4": rnd(ks[7], (Ch, Ch)),                    # up_p conv after PixelShuffle
        "wb1": rnd(ks[8], (C, C)),                      # up_b conv1 (with bias)
        "bb1": rnd(ks[9], (1, C), 0.1),
        "ab":  jnp.full((1, 1), 0.25, jnp.float32),
        "wb4": rnd(ks[10], (C, Ch)),                    # up_b final conv
        "wc":  rnd(ks[11], (C, Ch)),                    # final 1x1 conv on concat([p, b])
    }


def fold_params(p):
    """Algebraic folds + bf16 casts for MXU operands (biases / LN / slopes stay f32)."""
    C = p["wb1"].shape[0]
    Ch = C // 2
    # PixelShuffle: shuffled channel c of phase k=2i+j is conv1 output channel 4c+k.
    # Reorder conv1 columns phase-major (scalar PReLU slope commutes with this permutation;
    # a per-channel PReLU would need the same permutation applied to the slope vector).
    cols = (4 * jnp.arange(Ch)[None, :] + jnp.arange(4)[:, None]).reshape(-1)
    wp1r = p["wp1"][:, cols]                                   # (C, 2C)
    wct = p["wc"][:Ch]                                         # final-conv rows, pixel branch
    wcb = p["wc"][Ch:]                                         # final-conv rows, bilinear branch
    wpt = p["wp4"] @ wct                                       # folded pixel-shuffle tail (Ch, Ch)
    if 4 * Ch <= 256:
        wpt_arg = jnp.kron(jnp.eye(4, dtype=jnp.float32), wpt)   # lane-dense block-diag (2C, 2C)
    else:
        wpt_arg = wpt                                            # per-phase matmuls in-kernel
    wbc = p["wb4"] @ wcb                                       # folded bilinear tail (C, Ch)

    bf = lambda a: a.astype(jnp.bfloat16)
    wm_row = jnp.transpose(p["wm"], (0, 2, 1))                 # (depth, 1, C) for VPU logits
    ctx_args = [wm_row, p["bm"], p["w1"], p["b1"], p["lnw"], p["lnb"], p["w2"], p["b2"]]
    up_args = [bf(wp1r), p["ap"], bf(wpt_arg), bf(p["wb1"]), p["bb1"], p["ab"], bf(wbc)]
    return ctx_args, up_args


def _full_spec(arr):
    zeros = (0,) * arr.ndim
    return pl.BlockSpec(arr.shape, lambda b, t, _z=zeros: _z)


def _vmem_limit_bytes():
    try:
        cap = int(pltpu.get_tpu_info().vmem_capacity_bytes)    # generation-aware (v7x: 64 MiB)
    except Exception:
        cap = 64 * 1024 * 1024
    return min(cap // 2, 64 * 1024 * 1024)


def _bilinear_mix_dtype():
    # v6e / v7x have bf16 VALUs -> bf16 bilinear phase mixes; f32 on v5e/older or unknown.
    try:
        kind = jax.devices()[0].device_kind.lower()
    except Exception:
        return jnp.float32
    return jnp.bfloat16 if ("v6" in kind or "v7" in kind) else jnp.float32


def _choose_tile_rows(H, W, C, tile_rows):
    # Keep the per-tile live set to a few MiB so double-buffered blocks + intermediates
    # stay far below v7x's 64 MiB VMEM.  Shrink to a divisor of H.
    if tile_rows is None:
        budget_px = max(W, (8 * 1024 * 1024) // (14 * 4 * C))
        tile_rows = max(1, min(H, budget_px // W))
    tile_rows = max(1, min(H, int(tile_rows)))
    while H % tile_rows != 0:
        tile_rows -= 1
    return tile_rows


def basic_layer_up(x, params, *, data_format="NCHW", tile_rows=None):
    if data_format == "NCHW":
        B, C, H, W = x.shape
        # NOTE: this is a real HBM transpose pass, not free metadata; pass NHWC upstream
        # when possible to skip it.
        x_flat = jnp.transpose(x, (0, 2, 3, 1)).reshape(B, H * W, C)
    elif data_format == "NHWC":
        B, H, W, C = x.shape
        x_flat = x.reshape(B, H * W, C)
    else:
        raise ValueError(data_format)

    assert C % 2 == 0
    # TODO(synk): support W % 8 != 0 via an un-tiled fallback kernel.
    assert W % 8 == 0, "width must be a multiple of 8 for the tiled halo BlockSpecs"
    Ch = C // 2
    HW = H * W
    x_flat = x_flat.astype(jnp.float32)

    depth = params["wm"].shape[0]
    ctx_args, up_args = fold_params(params)
    TH = _choose_tile_rows(H, W, C, tile_rows)
    TILE = TH * W
    n_tiles = H // TH
    mix_dtype = _bilinear_mix_dtype()
    vmem_limit = _vmem_limit_bytes()

    # ---- pass 1: ContextBlock chain -> per-image channel-add vector (B, 1, C) ----
    add_vec = pl.pallas_call(
        context_chain_kernel,
        out_shape=jax.ShapeDtypeStruct((B, 1, C), jnp.float32),
        grid=(B, n_tiles),
        in_specs=[pl.BlockSpec((1, TILE, C), lambda b, t: (b, t, 0))]
                 + [_full_spec(a) for a in ctx_args],
        out_specs=pl.BlockSpec((1, 1, C), lambda b, t: (b, 0, 0)),
        scratch_shapes=[pltpu.VMEM((depth, 1, 1), jnp.float32),   # running max
                        pltpu.VMEM((depth, 1, 1), jnp.float32),   # running denom
                        pltpu.VMEM((depth, 1, C), jnp.float32)],  # running numerator
        compiler_params=pltpu.CompilerParams(
            dimension_semantics=("parallel", "arbitrary"),
            vmem_limit_bytes=vmem_limit),
    )(x_flat, *ctx_args)

    # ---- pass 2: UpSample, streamed over row tiles with edge-clamped 1-row halos ----
    above_spec = pl.BlockSpec((1, W, C),
                              lambda b, t: (b, jnp.maximum(t * TH - 1, 0), 0))
    below_spec = pl.BlockSpec((1, W, C),
                              lambda b, t: (b, jnp.minimum((t + 1) * TH, H - 1), 0))
    kernel = functools.partial(upsample_kernel, W=W, mix_dtype=mix_dtype)
    out_flat = pl.pallas_call(
        kernel,
        out_shape=jax.ShapeDtypeStruct((B, HW, 2 * C), jnp.float32),
        grid=(B, n_tiles),
        in_specs=[above_spec,
                  pl.BlockSpec((1, TILE, C), lambda b, t: (b, t, 0)),
                  below_spec,
                  pl.BlockSpec((1, 1, C), lambda b, t: (b, 0, 0))]
                 + [_full_spec(a) for a in up_args],
        out_specs=pl.BlockSpec((1, TILE, 2 * C), lambda b, t: (b, t, 0)),
        compiler_params=pltpu.CompilerParams(
            dimension_semantics=("parallel", "parallel"),   # spatial axis keeps v7x busy at B=1
            vmem_limit_bytes=vmem_limit),
    )(x_flat, x_flat, x_flat, add_vec, *up_args)

    # re-interleave phases: out[b, 2h+i, 2w+j, c] = out_flat[b, h*W+w, (2i+j)*Ch + c]
    out = out_flat.reshape(B, H, W, 2, 2, Ch)
    out = jnp.transpose(out, (0, 1, 3, 2, 4, 5)).reshape(B, 2 * H, 2 * W, Ch)
    if data_format == "NCHW":
        return jnp.transpose(out, (0, 3, 1, 2))             # (B, C//2, 2H, 2W)
    return out


# ---------------------------------------------------------------------------
# Faithful pure-JAX reference (per-block softmax recomputed, PixelShuffle, bilinear)
# ---------------------------------------------------------------------------
def _bilinear_x2(img):            # (B, H, W, C) -> (B, 2H, 2W, C), align_corners=False
    def resize_axis(a, axis):
        n = a.shape[axis]
        src = (jnp.arange(2 * n, dtype=jnp.float32) + 0.5) / 2.0 - 0.5
        src = jnp.clip(src, 0.0, n - 1.0)
        lo = jnp.floor(src).astype(jnp.int32)
        hi = jnp.minimum(lo + 1, n - 1)
        frac = src - lo.astype(jnp.float32)
        a_lo = jnp.take(a, lo, axis=axis)
        a_hi = jnp.take(a, hi, axis=axis)
        shape = [1] * a.ndim
        shape[axis] = 2 * n
        frac = frac.reshape(shape)
        return a_lo * (1.0 - frac) + a_hi * frac
    return resize_axis(resize_axis(img, 1), 2)


def reference_forward(x_nchw, p):
    B, C, H, W = x_nchw.shape
    Ch = C // 2
    hp = jax.lax.Precision.HIGHEST
    x = jnp.transpose(x_nchw, (0, 2, 3, 1)).reshape(B, H * W, C).astype(jnp.float32)
    depth = p["wm"].shape[0]
    for d in range(depth):
        logits = jnp.einsum("bpc,co->bpo", x, p["wm"][d], precision=hp) + p["bm"][d]
        w = jax.nn.softmax(logits, axis=1)                        # (B, HW, 1)
        ctx = jnp.einsum("bpc,bpo->boc", x, w, precision=hp)      # (B, 1, C)
        t = jnp.einsum("boc,cp->bop", ctx, p["w1"][d], precision=hp) + p["b1"][d]
        mu = jnp.mean(t, axis=-1, keepdims=True)
        var = jnp.mean((t - mu) ** 2, axis=-1, keepdims=True)
        t = (t - mu) * jax.lax.rsqrt(var + 1e-5) * p["lnw"][d] + p["lnb"][d]
        t = jnp.maximum(t, 0.0)
        x = x + jnp.einsum("bop,pc->boc", t, p["w2"][d], precision=hp) + p["b2"][d]
    x_img = x.reshape(B, H, W, C)

    a_p = p["ap"][0, 0]
    a_b = p["ab"][0, 0]
    # up_p: conv -> PReLU -> PixelShuffle(2) -> conv
    pp = jnp.einsum("bhwc,co->bhwo", x_img, p["wp1"], precision=hp)
    pp = jnp.where(pp >= 0, pp, a_p * pp)
    pp = pp.reshape(B, H, W, Ch, 2, 2)
    pp = jnp.transpose(pp, (0, 1, 4, 2, 5, 3)).reshape(B, 2 * H, 2 * W, Ch)
    x_p = jnp.einsum("bhwc,co->bhwo", pp, p["wp4"], precision=hp)
    # up_b: conv(+bias) -> PReLU -> bilinear x2 -> conv
    bb = jnp.einsum("bhwc,co->bhwo", x_img, p["wb1"], precision=hp) + p["bb1"]
    bb = jnp.where(bb >= 0, bb, a_b * bb)
    bb = _bilinear_x2(bb)
    x_b = jnp.einsum("bhwc,co->bhwo", bb, p["wb4"], precision=hp)
    # final conv on channel concat
    cat = jnp.concatenate([x_p, x_b], axis=-1)
    y = jnp.einsum("bhwc,co->bhwo", cat, p["wc"], precision=hp)
    return jnp.transpose(y, (0, 3, 1, 2))


if __name__ == "__main__":
    key = jax.random.PRNGKey(0)
    kx, kp = jax.random.split(key)

    # dim=64 so the phase-packed output last dim is 2*dim = 128 -> lane-dense store.
    B, dim, H, W = 2, 64, 16, 16
    depth, ratio = 2, 0.25

    x = jax.random.normal(kx, (B, dim, H, W), jnp.float32)
    params = build_params(kp, dim, depth, ratio)

    y = basic_layer_up(x, params, tile_rows=4)    # 4 row-tiles/image: exercises halo + pipeline
    jax.block_until_ready(y)
    assert y.shape == (B, dim // 2, 2 * H, 2 * W), y.shape
    assert bool(jnp.all(jnp.isfinite(y)))

    y_ref = reference_forward(x, params)
    err = float(jnp.max(jnp.abs(y - y_ref)) / (jnp.max(jnp.abs(y_ref)) + 1e-6))
    assert err < 5e-2, f"normalized max error too large: {err}"
    print("KERNEL_OK")
</pallas_src>

<mosaic_0001>
module attributes {stable_mosaic.version = 11 : i64} {
  func.func @context_chain_kernel(%arg0: i32, %arg1: i32, %arg2: memref<1x64x64xf32, #tpu.memory_space<vmem>>, %arg3: memref<2x1x64xf32, #tpu.memory_space<vmem>>, %arg4: memref<2x1x1xf32, #tpu.memory_space<vmem>>, %arg5: memref<2x64x16xf32, #tpu.memory_space<vmem>>, %arg6: memref<2x1x16xf32, #tpu.memory_space<vmem>>, %arg7: memref<2x1x16xf32, #tpu.memory_space<vmem>>, %arg8: memref<2x1x16xf32, #tpu.memory_space<vmem>>, %arg9: memref<2x16x64xf32, #tpu.memory_space<vmem>>, %arg10: memref<2x1x64xf32, #tpu.memory_space<vmem>>, %arg11: memref<1x1x64xf32, #tpu.memory_space<vmem>>, %arg12: memref<2x1x1xf32, #tpu.memory_space<vmem>>, %arg13: memref<2x1x1xf32, #tpu.memory_space<vmem>>, %arg14: memref<2x1x64xf32, #tpu.memory_space<vmem>>) attributes {dimension_semantics = [#tpu.dimension_semantics<parallel>, #tpu.dimension_semantics<arbitrary>], iteration_bounds = array<i64: 2, 4>, scalar_prefetch = 0 : i64, scratch_operands = 3 : i64, tpu.core_type = #tpu.core_type<tc>, window_params = [{transform_indices = @transform_0, window_bounds = array<i64: 1, 64, 64>}, {pipeline_mode = #tpu.pipeline_mode<synchronous>, transform_indices = @transform_1, window_bounds = array<i64: 2, 1, 64>}, {pipeline_mode = #tpu.pipeline_mode<synchronous>, transform_indices = @transform_2, window_bounds = array<i64: 2, 1, 1>}, {pipeline_mode = #tpu.pipeline_mode<synchronous>, transform_indices = @transform_3, window_bounds = array<i64: 2, 64, 16>}, {pipeline_mode = #tpu.pipeline_mode<synchronous>, transform_indices = @transform_4, window_bounds = array<i64: 2, 1, 16>}, {pipeline_mode = #tpu.pipeline_mode<synchronous>, transform_indices = @transform_5, window_bounds = array<i64: 2, 1, 16>}, {pipeline_mode = #tpu.pipeline_mode<synchronous>, transform_indices = @transform_6, window_bounds = array<i64: 2, 1, 16>}, {pipeline_mode = #tpu.pipeline_mode<synchronous>, transform_indices = @transform_7, window_bounds = array<i64: 2, 16, 64>}, {pipeline_mode = #tpu.pipeline_mode<synchronous>, transform_indices = @transform_8, window_bounds = array<i64: 2, 1, 64>}, {transform_indices = @transform_9, window_bounds = array<i64: 1, 1, 64>}]} {
    %c0_i32 = arith.constant 0 : i32
    %0 = arith.cmpi eq, %arg1, %c0_i32 : i32
    %1 = arith.extui %0 : i1 to i32
    %c0_i32_0 = arith.constant 0 : i32
    %2 = arith.cmpi ne, %1, %c0_i32_0 : i32
    scf.if %2 {
      %cst_58 = arith.constant 0xFF800000 : f32
      %96 = vector.broadcast %cst_58 : f32 to vector<2x1x1xf32>
      %c0_59 = arith.constant 0 : index
      %c0_60 = arith.constant 0 : index
      %c0_61 = arith.constant 0 : index
      %97 = vector.load %arg12[%c0_59, %c0_60, %c0_61] : memref<2x1x1xf32, #tpu.memory_space<vmem>>, vector<2x1x1xf32>
      tpu.vector_store %arg12[%c0_59, %c0_60, %c0_61], %96 {strides = array<i32>} : memref<2x1x1xf32, #tpu.memory_space<vmem>>, vector<2x1x1xf32>,
      %cst_62 = arith.constant 0.000000e+00 : f32
      %98 = vector.broadcast %cst_62 : f32 to vector<2x1x1xf32>
      %c0_63 = arith.constant 0 : index
      %c0_64 = arith.constant 0 : index
      %c0_65 = arith.constant 0 : index
      %99 = vector.load %arg13[%c0_63, %c0_64, %c0_65] : memref<2x1x1xf32, #tpu.memory_space<vmem>>, vector<2x1x1xf32>
      tpu.vector_store %arg13[%c0_63, %c0_64, %c0_65], %98 {strides = array<i32>} : memref<2x1x1xf32, #tpu.memory_space<vmem>>, vector<2x1x1xf32>,
      %cst_66 = arith.constant 0.000000e+00 : f32
      %100 = vector.broadcast %cst_66 : f32 to vector<2x1x64xf32>
      %c0_67 = arith.constant 0 : index
      %c0_68 = arith.constant 0 : index
      %c0_69 = arith.constant 0 : index
      %101 = vector.load %arg14[%c0_67, %c0_68, %c0_69] : memref<2x1x64xf32, #tpu.memory_space<vmem>>, vector<2x1x64xf32>
      tpu.vector_store %arg14[%c0_67, %c0_68, %c0_69], %100 {strides = array<i32>} : memref<2x1x64xf32, #tpu.memory_space<vmem>>, vector<2x1x64xf32>,
    } else {
    }
    %c0 = arith.constant 0 : index
    %c0_1 = arith.constant 0 : index
    %c0_2 = arith.constant 0 : index
    %3 = vector.load %arg2[%c0, %c0_1, %c0_2] : memref<1x64x64xf32, #tpu.memory_space<vmem>>, vector<1x64x64xf32>
    %4 = vector.shape_cast %3 : vector<1x64x64xf32> to vector<64x64xf32>
    %c0_3 = arith.constant 0 : index
    %c0_4 = arith.constant 0 : index
    %c0_5 = arith.constant 0 : index
    %5 = vector.load %arg3[%c0_3, %c0_4, %c0_5] : memref<2x1x64xf32, #tpu.memory_space<vmem>>, vector<1x1x64xf32>
    %6 = vector.shape_cast %5 : vector<1x1x64xf32> to vector<1x64xf32>
    %7 = vector.broadcast %6 : vector<1x64xf32> to vector<64x64xf32>
    %8 = arith.mulf %4, %7 : vector<64x64xf32>
    %cst = arith.constant dense<0.000000e+00> : vector<64xf32>
    %9 = vector.multi_reduction <add>, %8, %cst [1] : vector<64x64xf32> to vector<64xf32>
    %10 = vector.shape_cast %9 : vector<64xf32> to vector<64x1xf32>
    %c0_6 = arith.constant 0 : index
    %c0_7 = arith.constant 0 : index
    %c0_8 = arith.constant 0 : index
    %11 = vector.load %arg4[%c0_6, %c0_7, %c0_8] : memref<2x1x1xf32, #tpu.memory_space<vmem>>, vector<1x1x1xf32>
    %12 = vector.shape_cast %11 : vector<1x1x1xf32> to vector<1x1xf32>
    %13 = vector.broadcast %12 : vector<1x1xf32> to vector<64x1xf32>
    %14 = arith.addf %10, %13 : vector<64x1xf32>
    %c0_9 = arith.constant 0 : index
    %c0_10 = arith.constant 0 : index
    %c0_11 = arith.constant 0 : index
    %15 = vector.load %arg12[%c0_9, %c0_10, %c0_11] : memref<2x1x1xf32, #tpu.memory_space<vmem>>, vector<1x1x1xf32>
    %16 = vector.shape_cast %15 : vector<1x1x1xf32> to vector<1x1xf32>
    %cst_12 = arith.constant dense<0xFF800000> : vector<1xf32>
    %17 = vector.multi_reduction <maximumf>, %14, %cst_12 [0] : vector<64x1xf32> to vector<1xf32>
    %18 = vector.shape_cast %17 : vector<1xf32> to vector<1x1xf32>
    %19 = arith.maximumf %16, %18 : vector<1x1xf32>
    %20 = arith.subf %16, %19 : vector<1x1xf32>
    %21 = math.exp %20 : vector<1x1xf32>
    %22 = vector.broadcast %19 : vector<1x1xf32> to vector<64x1xf32>
    %23 = arith.subf %14, %22 : vector<64x1xf32>
    %24 = math.exp %23 : vector<64x1xf32>
    %c0_13 = arith.constant 0 : index
    %c0_14 = arith.constant 0 : index
    %c0_15 = arith.constant 0 : index
    %25 = vector.load %arg13[%c0_13, %c0_14, %c0_15] : memref<2x1x1xf32, #tpu.memory_space<vmem>>, vector<1x1x1xf32>
    %26 = vector.shape_cast %25 : vector<1x1x1xf32> to vector<1x1xf32>
    %27 = arith.mulf %26, %21 : vector<1x1xf32>
    %cst_16 = arith.constant dense<0.000000e+00> : vector<1xf32>
    %28 = vector.multi_reduction <add>, %24, %cst_16 [0] : vector<64x1xf32> to vector<1xf32>
    %29 = vector.shape_cast %28 : vector<1xf32> to vector<1x1xf32>
    %30 = arith.addf %27, %29 : vector<1x1xf32>
    %c0_17 = arith.constant 0 : index
    %c0_18 = arith.constant 0 : index
    %c0_19 = arith.constant 0 : index
    %31 = vector.load %arg13[%c0_17, %c0_18, %c0_19] : memref<2x1x1xf32, #tpu.memory_space<vmem>>, vector<1x1x1xf32>
    %32 = vector.shape_cast %31 : vector<1x1x1xf32> to vector<1x1xf32>
    %33 = vector.shape_cast %30 : vector<1x1xf32> to vector<1x1x1xf32>
    tpu.vector_store %arg13[%c0_17, %c0_18, %c0_19], %33 {strides = array<i32>} : memref<2x1x1xf32, #tpu.memory_space<vmem>>, vector<1x1x1xf32>,
    %c0_20 = arith.constant 0 : index
    %c0_21 = arith.constant 0 : index
    %c0_22 = arith.constant 0 : index
    %34 = vector.load %arg14[%c0_20, %c0_21, %c0_22] : memref<2x1x64xf32, #tpu.memory_space<vmem>>, vector<1x1x64xf32>
    %35 = vector.shape_cast %34 : vector<1x1x64xf32> to vector<1x64xf32>
    %36 = vector.broadcast %21 : vector<1x1xf32> to vector<1x64xf32>
    %37 = arith.mulf %35, %36 : vector<1x64xf32>
    %38 = vector.broadcast %24 : vector<64x1xf32> to vector<64x64xf32>
    %39 = arith.mulf %4, %38 : vector<64x64xf32>
    %cst_23 = arith.constant dense<0.000000e+00> : vector<64xf32>
    %40 = vector.multi_reduction <add>, %39, %cst_23 [0] : vector<64x64xf32> to vector<64xf32>
    %41 = vector.shape_cast %40 : vector<64xf32> to vector<1x64xf32>
    %42 = arith.addf %37, %41 : vector<1x64xf32>
    %c0_24 = arith.constant 0 : index
    %c0_25 = arith.constant 0 : index
    %c0_26 = arith.constant 0 : index
    %43 = vector.load %arg14[%c0_24, %c0_25, %c0_26] : memref<2x1x64xf32, #tpu.memory_space<vmem>>, vector<1x1x64xf32>
    %44 = vector.shape_cast %43 : vector<1x1x64xf32> to vector<1x64xf32>
    %45 = vector.shape_cast %42 : vector<1x64xf32> to vector<1x1x64xf32>
    tpu.vector_store %arg14[%c0_24, %c0_25, %c0_26], %45 {strides = array<i32>} : memref<2x1x64xf32, #tpu.memory_space<vmem>>, vector<1x1x64xf32>,
    %c0_27 = arith.constant 0 : index
    %c0_28 = arith.constant 0 : index
    %c0_29 = arith.constant 0 : index
    %46 = vector.load %arg12[%c0_27, %c0_28, %c0_29] : memref<2x1x1xf32, #tpu.memory_space<vmem>>, vector<1x1x1xf32>
    %47 = vector.shape_cast %46 : vector<1x1x1xf32> to vector<1x1xf32>
    %48 = vector.shape_cast %19 : vector<1x1xf32> to vector<1x1x1xf32>
    tpu.vector_store %arg12[%c0_27, %c0_28, %c0_29], %48 {strides = array<i32>} : memref<2x1x1xf32, #tpu.memory_space<vmem>>, vector<1x1x1xf32>,
    %c1 = arith.constant 1 : index
    %c0_30 = arith.constant 0 : index
    %c0_31 = arith.constant 0 : index
    %49 = vector.load %arg3[%c1, %c0_30, %c0_31] : memref<2x1x64xf32, #tpu.memory_space<vmem>>, vector<1x1x64xf32>
    %50 = vector.shape_cast %49 : vector<1x1x64xf32> to vector<1x64xf32>
    %51 = vector.broadcast %50 : vector<1x64xf32> to vector<64x64xf32>
    %52 = arith.mulf %4, %51 : vector<64x64xf32>
    %cst_32 = arith.constant dense<0.000000e+00> : vector<64xf32>
    %53 = vector.multi_reduction <add>, %52, %cst_32 [1] : vector<64x64xf32> to vector<64xf32>
    %54 = vector.shape_cast %53 : vector<64xf32> to vector<64x1xf32>
    %c1_33 = arith.constant 1 : index
    %c0_34 = arith.constant 0 : index
    %c0_35 = arith.constant 0 : index
    %55 = vector.load %arg4[%c1_33, %c0_34, %c0_35] : memref<2x1x1xf32, #tpu.memory_space<vmem>>, vector<1x1x1xf32>
    %56 = vector.shape_cast %55 : vector<1x1x1xf32> to vector<1x1xf32>
    %57 = vector.broadcast %56 : vector<1x1xf32> to vector<64x1xf32>
    %58 = arith.addf %54, %57 : vector<64x1xf32>
    %c1_36 = arith.constant 1 : index
    %c0_37 = arith.constant 0 : index
    %c0_38 = arith.constant 0 : index
    %59 = vector.load %arg12[%c1_36, %c0_37, %c0_38] : memref<2x1x1xf32, #tpu.memory_space<vmem>>, vector<1x1x1xf32>
    %60 = vector.shape_cast %59 : vector<1x1x1xf32> to vector<1x1xf32>
    %cst_39 = arith.constant dense<0xFF800000> : vector<1xf32>
    %61 = vector.multi_reduction <maximumf>, %58, %cst_39 [0] : vector<64x1xf32> to vector<1xf32>
    %62 = vector.shape_cast %61 : vector<1xf32> to vector<1x1xf32>
    %63 = arith.maximumf %60, %62 : vector<1x1xf32>
    %64 = arith.subf %60, %63 : vector<1x1xf32>
    %65 = math.exp %64 : vector<1x1xf32>
    %66 = vector.broadcast %63 : vector<1x1xf32> to vector<64x1xf32>
    %67 = arith.subf %58, %66 : vector<64x1xf32>
    %68 = math.exp %67 : vector<64x1xf32>
    %c1_40 = arith.constant 1 : index
    %c0_41 = arith.constant 0 : index
    %c0_42 = arith.constant 0 : index
    %69 = vector.load %arg13[%c1_40, %c0_41, %c0_42] : memref<2x1x1xf32, #tpu.memory_space<vmem>>, vector<1x1x1xf32>
    %70 = vector.shape_cast %69 : vector<1x1x1xf32> to vector<1x1xf32>
    %71 = arith.mulf %70, %65 : vector<1x1xf32>
    %cst_43 = arith.constant dense<0.000000e+00> : vector<1xf32>
    %72 = vector.multi_reduction <add>, %68, %cst_43 [0] : vector<64x1xf32> to vector<1xf32>
    %73 = vector.shape_cast %72 : vector<1xf32> to vector<1x1xf32>
    %74 = arith.addf %71, %73 : vector<1x1xf32>
    %c1_44 = arith.constant 1 : index
    %c0_45 = arith.constant 0 : index
    %c0_46 = arith.constant 0 : index
    %75 = vector.load %arg13[%c1_44, %c0_45, %c0_46] : memref<2x1x1xf32, #tpu.memory_space<vmem>>, vector<1x1x1xf32>
    %76 = vector.shape_cast %75 : vector<1x1x1xf32> to vector<1x1xf32>
    %77 = vector.shape_cast %74 : vector<1x1xf32> to vector<1x1x1xf32>
    tpu.vector_store %arg13[%c1_44, %c0_45, %c0_46], %77 {strides = array<i32>} : memref<2x1x1xf32, #tpu.memory_space<vmem>>, vector<1x1x1xf32>,
    %c1_47 = arith.constant 1 : index
    %c0_48 = arith.constant 0 : index
    %c0_49 = arith.constant 0 : index
    %78 = vector.load %arg14[%c1_47, %c0_48, %c0_49] : memref<2x1x64xf32, #tpu.memory_space<vmem>>, vector<1x1x64xf32>
    %79 = vector.shape_cast %78 : vector<1x1x64xf32> to vector<1x64xf32>
    %80 = vector.broadcast %65 : vector<1x1xf32> to vector<1x64xf32>
    %81 = arith.mulf %79, %80 : vector<1x64xf32>
    %82 = vector.broadcast %68 : vector<64x1xf32> to vector<64x64xf32>
    %83 = arith.mulf %4, %82 : vector<64x64xf32>
    %cst_50 = arith.constant dense<0.000000e+00> : vector<64xf32>
    %84 = vector.multi_reduction <add>, %83, %cst_50 [0] : vector<64x64xf32> to vector<64xf32>
    %85 = vector.shape_cast %84 : vector<64xf32> to vector<1x64xf32>
    %86 = arith.addf %81, %85 : vector<1x64xf32>
    %c1_51 = arith.constant 1 : index
    %c0_52 = arith.constant 0 : index
    %c0_53 = arith.constant 0 : index
    %87 = vector.load %arg14[%c1_51, %c0_52, %c0_53] : memref<2x1x64xf32, #tpu.memory_space<vmem>>, vector<1x1x64xf32>
    %88 = vector.shape_cast %87 : vector<1x1x64xf32> to vector<1x64xf32>
    %89 = vector.shape_cast %86 : vector<1x64xf32> to vector<1x1x64xf32>
    tpu.vector_store %arg14[%c1_51, %c0_52, %c0_53], %89 {strides = array<i32>} : memref<2x1x64xf32, #tpu.memory_space<vmem>>, vector<1x1x64xf32>,
    %c1_54 = arith.constant 1 : index
    %c0_55 = arith.constant 0 : index
    %c0_56 = arith.constant 0 : index
    %90 = vector.load %arg12[%c1_54, %c0_55, %c0_56] : memref<2x1x1xf32, #tpu.memory_space<vmem>>, vector<1x1x1xf32>
    %91 = vector.shape_cast %90 : vector<1x1x1xf32> to vector<1x1xf32>
    %92 = vector.shape_cast %63 : vector<1x1xf32> to vector<1x1x1xf32>
    tpu.vector_store %arg12[%c1_54, %c0_55, %c0_56], %92 {strides = array<i32>} : memref<2x1x1xf32, #tpu.memory_space<vmem>>, vector<1x1x1xf32>,
    %c3_i32 = arith.constant 3 : i32
    %93 = arith.cmpi eq, %arg1, %c3_i32 : i32
    %94 = arith.extui %93 : i1 to i32
    %c0_i32_57 = arith.constant 0 : i32
    %95 = arith.cmpi ne, %94, %c0_i32_57 : i32
    scf.if %95 {
      %cst_58 = arith.constant 0.000000e+00 : f32
      %96 = vector.broadcast %cst_58 : f32 to vector<1x64xf32>
      %c0_59 = arith.constant 0 : index
      %c0_60 = arith.constant 0 : index
      %c0_61 = arith.constant 0 : index
      %97 = vector.load %arg14[%c0_59, %c0_60, %c0_61] : memref<2x1x64xf32, #tpu.memory_space<vmem>>, vector<1x1x64xf32>
      %98 = vector.shape_cast %97 : vector<1x1x64xf32> to vector<1x64xf32>
      %c0_62 = arith.constant 0 : index
      %c0_63 = arith.constant 0 : index
      %c0_64 = arith.constant 0 : index
      %99 = vector.load %arg13[%c0_62, %c0_63, %c0_64] : memref<2x1x1xf32, #tpu.memory_space<vmem>>, vector<1x1x1xf32>
      %100 = vector.shape_cast %99 : vector<1x1x1xf32> to vector<1x1xf32>
      %101 = vector.broadcast %100 : vector<1x1xf32> to vector<1x64xf32>
      %102 = arith.divf %98, %101 : vector<1x64xf32>
      %103 = arith.addf %102, %96 : vector<1x64xf32>
      %c0_65 = arith.constant 0 : index
      %c0_66 = arith.constant 0 : index
      %c0_67 = arith.constant 0 : index
      %104 = vector.load %arg5[%c0_65, %c0_66, %c0_67] : memref<2x64x16xf32, #tpu.memory_space<vmem>>, vector<1x64x16xf32>
      %105 = vector.shape_cast %104 : vector<1x64x16xf32> to vector<64x16xf32>
      %cst_68 = arith.constant dense<0.000000e+00> : vector<1x16xf32>
      %106 = tpu.matmul %103, %105, %cst_68 {dimension_numbers = #tpu.dot_dimension_numbers<[1], [0], [0], [1], [0, 0, 1, 1], [], []>} : vector<1x64xf32>, vector<64x16xf32>, vector<1x16xf32> -> vector<1x16xf32>
      %c0_69 = arith.constant 0 : index
      %c0_70 = arith.constant 0 : index
      %c0_71 = arith.constant 0 : index
      %107 = vector.load %arg6[%c0_69, %c0_70, %c0_71] : memref<2x1x16xf32, #tpu.memory_space<vmem>>, vector<1x1x16xf32>
      %108 = vector.shape_cast %107 : vector<1x1x16xf32> to vector<1x16xf32>
      %109 = arith.addf %106, %108 : vector<1x16xf32>
      %cst_72 = arith.constant dense<0.000000e+00> : vector<1xf32>
      %110 = vector.multi_reduction <add>, %109, %cst_72 [1] : vector<1x16xf32> to vector<1xf32>
      %111 = vector.shape_cast %110 : vector<1xf32> to vector<1x1xf32>
      %cst_73 = arith.constant 1.600000e+01 : f32
      %112 = vector.broadcast %cst_73 : f32 to vector<1x1xf32>
      %113 = arith.divf %111, %112 : vector<1x1xf32>
      %114 = vector.broadcast %113 : vector<1x1xf32> to vector<1x16xf32>
      %115 = arith.subf %109, %114 : vector<1x16xf32>
      %116 = arith.mulf %115, %115 : vector<1x16xf32>
      %cst_74 = arith.constant dense<0.000000e+00> : vector<1xf32>
      %117 = vector.multi_reduction <add>, %116, %cst_74 [1] : vector<1x16xf32> to vector<1xf32>
      %118 = vector.shape_cast %117 : vector<1xf32> to vector<1x1xf32>
      %cst_75 = arith.constant 1.600000e+01 : f32
      %119 = vector.broadcast %cst_75 : f32 to vector<1x1xf32>
      %120 = arith.divf %118, %119 : vector<1x1xf32>
      %121 = vector.broadcast %113 : vector<1x1xf32> to vector<1x16xf32>
      %122 = arith.subf %109, %121 : vector<1x16xf32>
      %cst_76 = arith.constant 9.99999974E-6 : f32
      %123 = vector.broadcast %cst_76 : f32 to vector<1x1xf32>
      %124 = arith.addf %120, %123 : vector<1x1xf32>
      %125 = math.rsqrt %124 : vector<1x1xf32>
      %126 = vector.broadcast %125 : vector<1x1xf32> to vector<1x16xf32>
      %127 = arith.mulf %122, %126 : vector<1x16xf32>
      %c0_77 = arith.constant 0 : index
      %c0_78 = arith.constant 0 : index
      %c0_79 = arith.constant 0 : index
      %128 = vector.load %arg7[%c0_77, %c0_78, %c0_79] : memref<2x1x16xf32, #tpu.memory_space<vmem>>, vector<1x1x16xf32>
      %129 = vector.shape_cast %128 : vector<1x1x16xf32> to vector<1x16xf32>
      %130 = arith.mulf %127, %129 : vector<1x16xf32>
      %c0_80 = arith.constant 0 : index
      %c0_81 = arith.constant 0 : index
      %c0_82 = arith.constant 0 : index
      %131 = vector.load %arg8[%c0_80, %c0_81, %c0_82] : memref<2x1x16xf32, #tpu.memory_space<vmem>>, vector<1x1x16xf32>
      %132 = vector.shape_cast %131 : vector<1x1x16xf32> to vector<1x16xf32>
      %133 = arith.addf %130, %132 : vector<1x16xf32>
      %cst_83 = arith.constant 0.000000e+00 : f32
      %134 = vector.broadcast %cst_83 : f32 to vector<1x16xf32>
      %135 = arith.maximumf %133, %134 : vector<1x16xf32>
      %c0_84 = arith.constant 0 : index
      %c0_85 = arith.constant 0 : index
      %c0_86 = arith.constant 0 : index
      %136 = vector.load %arg9[%c0_84, %c0_85, %c0_86] : memref<2x16x64xf32, #tpu.memory_space<vmem>>, vector<1x16x64xf32>
      %137 = vector.shape_cast %136 : vector<1x16x64xf32> to vector<16x64xf32>
      %cst_87 = arith.constant dense<0.000000e+00> : vector<1x64xf32>
      %138 = tpu.matmul %135, %137, %cst_87 {dimension_numbers = #tpu.dot_dimension_numbers<[1], [0], [0], [1], [0, 0, 1, 1], [], []>} : vector<1x16xf32>, vector<16x64xf32>, vector<1x64xf32> -> vector<1x64xf32>
      %c0_88 = arith.constant 0 : index
      %c0_89 = arith.constant 0 : index
      %c0_90 = arith.constant 0 : index
      %139 = vector.load %arg10[%c0_88, %c0_89, %c0_90] : memref<2x1x64xf32, #tpu.memory_space<vmem>>, vector<1x1x64xf32>
      %140 = vector.shape_cast %139 : vector<1x1x64xf32> to vector<1x64xf32>
      %141 = arith.addf %138, %140 : vector<1x64xf32>
      %142 = arith.addf %96, %141 : vector<1x64xf32>
      %c1_91 = arith.constant 1 : index
      %c0_92 = arith.constant 0 : index
      %c0_93 = arith.constant 0 : index
      %143 = vector.load %arg14[%c1_91, %c0_92, %c0_93] : memref<2x1x64xf32, #tpu.memory_space<vmem>>, vector<1x1x64xf32>
      %144 = vector.shape_cast %143 : vector<1x1x64xf32> to vector<1x64xf32>
      %c1_94 = arith.constant 1 : index
      %c0_95 = arith.constant 0 : index
      %c0_96 = arith.constant 0 : index
      %145 = vector.load %arg13[%c1_94, %c0_95, %c0_96] : memref<2x1x1xf32, #tpu.memory_space<vmem>>, vector<1x1x1xf32>
      %146 = vector.shape_cast %145 : vector<1x1x1xf32> to vector<1x1xf32>
      %147 = vector.broadcast %146 : vector<1x1xf32> to vector<1x64xf32>
      %148 = arith.divf %144, %147 : vector<1x64xf32>
      %149 = arith.addf %148, %142 : vector<1x64xf32>
      %c1_97 = arith.constant 1 : index
      %c0_98 = arith.constant 0 : index
      %c0_99 = arith.constant 0 : index
      %150 = vector.load %arg5[%c1_97, %c0_98, %c0_99] : memref<2x64x16xf32, #tpu.memory_space<vmem>>, vector<1x64x16xf32>
      %151 = vector.shape_cast %150 : vector<1x64x16xf32> to vector<64x16xf32>
      %cst_100 = arith.constant dense<0.000000e+00> : vector<1x16xf32>
      %152 = tpu.matmul %149, %151, %cst_100 {dimension_numbers = #tpu.dot_dimension_numbers<[1], [0], [0], [1], [0, 0, 1, 1], [], []>} : vector<1x64xf32>, vector<64x16xf32>, vector<1x16xf32> -> vector<1x16xf32>
      %c1_101 = arith.constant 1 : index
      %c0_102 = arith.constant 0 : index
      %c0_103 = arith.constant 0 : index
      %153 = vector.load %arg6[%c1_101, %c0_102, %c0_103] : memref<2x1x16xf32, #tpu.memory_space<vmem>>, vector<1x1x16xf32>
      %154 = vector.shape_cast %153 : vector<1x1x16xf32> to vector<1x16xf32>
      %155 = arith.addf %152, %154 : vector<1x16xf32>
      %cst_104 = arith.constant dense<0.000000e+00> : vector<1xf32>
      %156 = vector.multi_reduction <add>, %155, %cst_104 [1] : vector<1x16xf32> to vector<1xf32>
      %157 = vector.shape_cast %156 : vector<1xf32> to vector<1x1xf32>
      %cst_105 = arith.constant 1.600000e+01 : f32
      %158 = vector.broadcast %cst_105 : f32 to vector<1x1xf32>
      %159 = arith.divf %157, %158 : vector<1x1xf32>
      %160 = vector.broadcast %159 : vector<1x1xf32> to vector<1x16xf32>
      %161 = arith.subf %155, %160 : vector<1x16xf32>
      %162 = arith.mulf %161, %161 : vector<1x16xf32>
      %cst_106 = arith.constant dense<0.000000e+00> : vector<1xf32>
      %163 = vector.multi_reduction <add>, %162, %cst_106 [1] : vector<1x16xf32> to vector<1xf32>
      %164 = vector.shape_cast %163 : vector<1xf32> to vector<1x1xf32>
      %cst_107 = arith.constant 1.600000e+01 : f32
      %165 = vector.broadcast %cst_107 : f32 to vector<1x1xf32>
      %166 = arith.divf %164, %165 : vector<1x1xf32>
      %167 = vector.broadcast %159 : vector<1x1xf32> to vector<1x16xf32>
      %168 = arith.subf %155, %167 : vector<1x16xf32>
      %cst_108 = arith.constant 9.99999974E-6 : f32
      %169 = vector.broadcast %cst_108 : f32 to vector<1x1xf32>
      %170 = arith.addf %166, %169 : vector<1x1xf32>
      %171 = math.rsqrt %170 : vector<1x1xf32>
      %172 = vector.broadcast %171 : vector<1x1xf32> to vector<1x16xf32>
      %173 = arith.mulf %168, %172 : vector<1x16xf32>
      %c1_109 = arith.constant 1 : index
      %c0_110 = arith.constant 0 : index
      %c0_111 = arith.constant 0 : index
      %174 = vector.load %arg7[%c1_109, %c0_110, %c0_111] : memref<2x1x16xf32, #tpu.memory_space<vmem>>, vector<1x1x16xf32>
      %175 = vector.shape_cast %174 : vector<1x1x16xf32> to vector<1x16xf32>
      %176 = arith.mulf %173, %175 : vector<1x16xf32>
      %c1_112 = arith.constant 1 : index
      %c0_113 = arith.constant 0 : index
      %c0_114 = arith.constant 0 : index
      %177 = vector.load %arg8[%c1_112, %c0_113, %c0_114] : memref<2x1x16xf32, #tpu.memory_space<vmem>>, vector<1x1x16xf32>
      %178 = vector.shape_cast %177 : vector<1x1x16xf32> to vector<1x16xf32>
      %179 = arith.addf %176, %178 : vector<1x16xf32>
      %cst_115 = arith.constant 0.000000e+00 : f32
      %180 = vector.broadcast %cst_115 : f32 to vector<1x16xf32>
      %181 = arith.maximumf %179, %180 : vector<1x16xf32>
      %c1_116 = arith.constant 1 : index
      %c0_117 = arith.constant 0 : index
      %c0_118 = arith.constant 0 : index
      %182 = vector.load %arg9[%c1_116, %c0_117, %c0_118] : memref<2x16x64xf32, #tpu.memory_space<vmem>>, vector<1x16x64xf32>
      %183 = vector.shape_cast %182 : vector<1x16x64xf32> to vector<16x64xf32>
      %cst_119 = arith.constant dense<0.000000e+00> : vector<1x64xf32>
      %184 = tpu.matmul %181, %183, %cst_119 {dimension_numbers = #tpu.dot_dimension_numbers<[1], [0], [0], [1], [0, 0, 1, 1], [], []>} : vector<1x16xf32>, vector<16x64xf32>, vector<1x64xf32> -> vector<1x64xf32>
      %c1_120 = arith.constant 1 : index
      %c0_121 = arith.constant 0 : index
      %c0_122 = arith.constant 0 : index
      %185 = vector.load %arg10[%c1_120, %c0_121, %c0_122] : memref<2x1x64xf32, #tpu.memory_space<vmem>>, vector<1x1x64xf32>
      %186 = vector.shape_cast %185 : vector<1x1x64xf32> to vector<1x64xf32>
      %187 = arith.addf %184, %186 : vector<1x64xf32>
      %188 = arith.addf %142, %187 : vector<1x64xf32>
      %c0_123 = arith.constant 0 : index
      %c0_124 = arith.constant 0 : index
      %c0_125 = arith.constant 0 : index
      %189 = vector.load %arg11[%c0_123, %c0_124, %c0_125] : memref<1x1x64xf32, #tpu.memory_space<vmem>>, vector<1x1x64xf32>
      %190 = vector.shape_cast %189 : vector<1x1x64xf32> to vector<1x64xf32>
      %191 = vector.shape_cast %188 : vector<1x64xf32> to vector<1x1x64xf32>
      tpu.vector_store %arg11[%c0_123, %c0_124, %c0_125], %191 {strides = array<i32>} : memref<1x1x64xf32, #tpu.memory_space<vmem>>, vector<1x1x64xf32>,
    } else {
    }
    return
  }
  func.func @transform_0(%arg0: i32, %arg1: i32) -> (i32, i32, i32) {
    %c0_i32 = arith.constant 0 : i32
    %c0_i32_0 = arith.constant 0 : i32
    return %arg0, %arg1, %c0_i32 : i32, i32, i32
  }
  func.func @transform_1(%arg0: i32, %arg1: i32) -> (i32, i32, i32) {
    %c0_i32 = arith.constant 0 : i32
    %c0_i32_0 = arith.constant 0 : i32
    %c0_i32_1 = arith.constant 0 : i32
    %c0_i32_2 = arith.constant 0 : i32
    return %c0_i32, %c0_i32_0, %c0_i32_1 : i32, i32, i32
  }
  func.func @transform_2(%arg0: i32, %arg1: i32) -> (i32, i32, i32) {
    %c0_i32 = arith.constant 0 : i32
    %c0_i32_0 = arith.constant 0 : i32
    %c0_i32_1 = arith.constant 0 : i32
    %c0_i32_2 = arith.constant 0 : i32
    return %c0_i32, %c0_i32_0, %c0_i32_1 : i32, i32, i32
  }
  func.func @transform_3(%arg0: i32, %arg1: i32) -> (i32, i32, i32) {
    %c0_i32 = arith.constant 0 : i32
    %c0_i32_0 = arith.constant 0 : i32
    %c0_i32_1 = arith.constant 0 : i32
    %c0_i32_2 = arith.constant 0 : i32
    return %c0_i32, %c0_i32_0, %c0_i32_1 : i32, i32, i32
  }
  func.func @transform_4(%arg0: i32, %arg1: i32) -> (i32, i32, i32) {
    %c0_i32 = arith.constant 0 : i32
    %c0_i32_0 = arith.constant 0 : i32
    %c0_i32_1 = arith.constant 0 : i32
    %c0_i32_2 = arith.constant 0 : i32
    return %c0_i32, %c0_i32_0, %c0_i32_1 : i32, i32, i32
  }
  func.func @transform_5(%arg0: i32, %arg1: i32) -> (i32, i32, i32) {
    %c0_i32 = arith.constant 0 : i32
    %c0_i32_0 = arith.constant 0 : i32
    %c0_i32_1 = arith.constant 0 : i32
    %c0_i32_2 = arith.constant 0 : i32
    return %c0_i32, %c0_i32_0, %c0_i32_1 : i32, i32, i32
  }
  func.func @transform_6(%arg0: i32, %arg1: i32) -> (i32, i32, i32) {
    %c0_i32 = arith.constant 0 : i32
    %c0_i32_0 = arith.constant 0 : i32
    %c0_i32_1 = arith.constant 0 : i32
    %c0_i32_2 = arith.constant 0 : i32
    return %c0_i32, %c0_i32_0, %c0_i32_1 : i32, i32, i32
  }
  func.func @transform_7(%arg0: i32, %arg1: i32) -> (i32, i32, i32) {
    %c0_i32 = arith.constant 0 : i32
    %c0_i32_0 = arith.constant 0 : i32
    %c0_i32_1 = arith.constant 0 : i32
    %c0_i32_2 = arith.constant 0 : i32
    return %c0_i32, %c0_i32_0, %c0_i32_1 : i32, i32, i32
  }
  func.func @transform_8(%arg0: i32, %arg1: i32) -> (i32, i32, i32) {
    %c0_i32 = arith.constant 0 : i32
    %c0_i32_0 = arith.constant 0 : i32
    %c0_i32_1 = arith.constant 0 : i32
    %c0_i32_2 = arith.constant 0 : i32
    return %c0_i32, %c0_i32_0, %c0_i32_1 : i32, i32, i32
  }
  func.func @transform_9(%arg0: i32, %arg1: i32) -> (i32, i32, i32) {
    %c0_i32 = arith.constant 0 : i32
    %c0_i32_0 = arith.constant 0 : i32
    %c0_i32_1 = arith.constant 0 : i32
    return %arg0, %c0_i32, %c0_i32_0 : i32, i32, i32
  }
}

</mosaic_0001>

<bundles_post_ra>
// kernel: tpu_custom_call.1
= control target key start
LH: loop header
LB: loop body
LE: loop exit
PB: predicated region body
PF: predicated region fallthrough
CT: control target
= control target key end

     0   :  { %s2198_s0 = inlined_call_operand.vmem [shape: f32[2,256,64], index: 0, kind: input, shape index: {}]   ;;  %s2199_s1 = inlined_call_operand.vmem [shape: f32[2,1,64], index: 1, kind: input, shape index: {}]   ;;  %s2200_s2 = inlined_call_operand.vmem [shape: f32[2,1,1], index: 2, kind: input, shape index: {}]   ;;  %s2201_s3 = inlined_call_operand.vmem [shape: f32[2,64,16], index: 3, kind: input, shape index: {}]   ;;  %s2202_s4 = inlined_call_operand.vmem [shape: f32[2,1,16], index: 4, kind: input, shape index: {}]   ;;  %s2203_s5 = inlined_call_operand.vmem [shape: f32[2,1,16], index: 5, kind: input, shape index: {}]   ;;  %s2204_s6 = inlined_call_operand.vmem [shape: f32[2,1,16], index: 6, kind: input, shape index: {}]   ;;  %s2205_s7 = inlined_call_operand.vmem [shape: f32[2,16,64], index: 7, kind: input, shape index: {}]   ;;  %s2206_s8 = inlined_call_operand.vmem [shape: f32[2,1,64], index: 8, kind: input, shape index: {}]   ;;  %s2207_s9 = inlined_call_operand.hbm [shape: f32[2,1,64], index: 9, kind: output, shape index: {}]  }
   0x1   :  { %2209 = sst [smem:[#allocation10_spill]] %s2198_s0 }
   0x2   :  { %14 = vsyncpa [#allocation6], 0 }
   0x3   :  { %16 = vsyncpa [#allocation6 + $0x1], 0  ;;  %s1727_s30 = smov 0   ;;  %s1729_s10 = smov 0  }
   0x4   :  { %s1731_s11 = smov 0   ;;  %s1733_s12 = smov 0  }
   0x5   :  { %s1735_s13 = smov 0   ;;  %s1737_s14 = smov 0  }
   0x6   :  { %s1739_s15 = smov 0   ;;  %s1741_s16 = smov 0  }
   0x7 LB: > { %s1304_s17 = sadd.s32 4294967295, %s1667_s16   ;;  %s1305_s18 = sadd.s32 4294967294, %s1667_s16   ;;  %s1667_s16 = sphi %s1741_s16, %s22_s16   ;;  %s1663_s15 = sphi %s1739_s15, %s2223_s15   ;;  %s1659_s14 = sphi %s1737_s14, %s2222_s14   ;;  %s1655_s13 = sphi %s1735_s13, %s2221_s13   ;;  %s1651_s12 = sphi %s1733_s12, %s2220_s12   ;;  %s1647_s11 = sphi %s1731_s11, %s2219_s11   ;;  %s1643_s10 = sphi %s1729_s10, %s2218_s10   ;;  %s1639_s30 = sphi %s1727_s30, %s2217_s30  }
   0x8   : > { %s31_s19 = sadd.s32 1, %s1659_s14  ;;  %s34_s20 = sadd.s32 1, %s1663_s15 }
   0x9   : > { %p32_p0 = scmp.ge.s32.totalorder %s31_s19, 4  ;;  %p247_p1 = scmp.ne.s32.totalorder %s1647_s11, %s1643_s10 }
   0xa   : > { %p248_p2 = scmp.eq.s32.totalorder %s1304_s17, 7  ;;  %p253_p4 = scmp.ne.s32.totalorder %s1643_s10, %s1639_s30 }
   0xb   : > { %s2225_s19 = smov (%p32_p0, %s31_s19), 0  ;;  %s2227_s20 = smov (!%p32_p0, %s34_s20), %s1663_s15 }
   0xc   : > { %2210 = sst [smem:[#allocation8_spill]] %s2225_s19  ;;  %p1776_p3 = por %p248_p2, %p247_p1 }
   0xd   : > { %p36_p5 = scmp.ge.s32.totalorder %s2227_s20, 2  ;;  %p254_p6 = scmp.eq.s32.totalorder %s1305_s18, 7 }
   0xe   : > { %p1308_p7 = scmp.ge.s32.totalorder %s1667_s16, 1  ;;  %p309_p8 = scmp.lt.s32.totalorder %s1667_s16, 9 }
   0xf   : > { %s2229_s20 = smov (%p36_p5, %s2227_s20), 0  ;;  %p1786_p9 = por %p254_p6, %p253_p4 }
  0x10   : > { %2212 = sst [smem:[#allocation9_spill]] %s2229_s20  ;;  %p310_p10 = pnand %p1308_p7, %p309_p8 }
  0x11   : > { %s234_s23 = ssub.s32 %s1663_s15, %s2229_s20  ;;  %s237_s24 = sadd.s32 1, %s1647_s11 }
  0x12   : > { %p235_p11 = scmp.eq.s32.totalorder %s234_s23, 0  ;;  %313 = sbr.rel (%p310_p10) target bundleno = 2060 (0x80c), region = 56 }
  0x13   : > { %s346_s26 = sand.u32 (!%p310_p10), 1, %s1643_s10   ;;  %s1309_s27 = sshll.u32 (!%p310_p10), %s1651_s12, 3 }
  0x14   : > { %s1794_s25 = scalar_select %p235_p11, %s1647_s11, %s237_s24  }
  0x15   : > { %p349_p12 = scmp.lt.s32.totalorder (!%p310_p10), %s1655_s13, 1  ;;  %p351_p13 = scmp.lt.s32.totalorder (!%p310_p10), %s1309_s27, 31 }
  0x16   : > { %s2214_s0 = sld [smem:[#allocation10_spill]] (!%p310_p10)  ;;  %s1807_s24 = scalar_lea.vmem (!%p310_p10), [#allocation5], %s346_s26 }
  0x17   : > { %p1312_p0 = scmp.ne.s32.totalorder (!%p310_p10), %s1651_s12, 0 }
  0x19   : > { %s350_s28 = scalar_select %p349_p12, %s1655_s13, 1 }
  0x1a   : > { %s2231_s27 = smov (!%p351_p13, %s1309_s27), 31  ;;  %361 = sbr.rel (%p1312_p0) target bundleno = 33 (0x21), region = 60 }
  0x1b   : > { %s1310_s29 = sshll.u32 %s350_s28, 5  ;;  %vm362_vm0 = vcmask (!%p1312_p0), 0   ;;  %vm367_vm1 = vcmask (!%p1312_p0), 516096   ;;  %v1669_v0 = vmov (!%p1312_p0), -inf   ;;  %v1670_v1 = vmov (!%p1312_p0), 0.0  }
  0x1c   : > { %s354_s17 = sadd.s32 %s1310_s29, %s2231_s27  ;;  %363 = vst.msk [vmem:[#allocation2] sm:$0x1] (!%p1312_p0), %vm362_vm0, %v1669_v0  ;;  %364 = vst.msk [vmem:[#allocation2 + $0x1] sm:$0x1] (!%p1312_p0), %vm362_vm0, %v1669_v0 }
  0x1d   : > { %s1311_s18 = sshll.u32 %s354_s17, 3  ;;  %365 = vst.msk [vmem:[#allocation3] sm:$0x1] (!%p1312_p0), %vm362_vm0, %v1670_v1  ;;  %366 = vst.msk [vmem:[#allocation3 + $0x1] sm:$0x1] (!%p1312_p0), %vm362_vm0, %v1670_v1 }
  0x1e   : > { %s1803_s23 = scalar_lea.vmem %s2214_s0, %s1311_s18  ;;  %368 = vst.msk [vmem:[#allocation4] sm:$0x1] (!%p1312_p0), %vm367_vm1, %v1670_v1  ;;  %369 = vst.msk [vmem:[#allocation4 + $0x1] sm:$0x1] (!%p1312_p0), %vm367_vm1, %v1670_v1 }
  0x21 PF: > { %v1811_v2 = vld [vmem:[%s1803_s23 + $0x10] sm:$0xff]  ;;  %v1313_v3 = vld [vmem:[%s2199_s1] ss:$0 sm:$0xff]  ;;  %vm393_vm2 = vcmask 523264   ;;  %v1822_v7 = vld [vmem:[%s1803_s23 + $0x18] sm:$0xff]  ;;  %v1671_v44 = vmov 0  }
  0x22   : > { %v1817_v4 = vld [vmem:[%s1803_s23] sm:$0xff]  ;;  %v387_v5 = vmul.f32 %v1313_v3, %v1811_v2  ;;  %v1825_v8 = vld [vmem:[%s1803_s23 + $0x8] sm:$0xff]  ;;  %v388_v9 = vmul.f32 %v1313_v3, %v1822_v7  ;;  %v1842_v19 = vld [vmem:[%s1803_s23 + $0x38] sm:$0xff]  ;;  %1525 = vset.pattern.permute.xlu0 %v1671_v44  ;;  %1526 = vset.pattern.permute.xlu1 %v1671_v44  ;;  %vm434_vm3 = vcmask 7168   ;;  %vm514_vm4 = vcmask 0   ;;  %p1319_p1 = scmp.ne.s32.totalorder %s1651_s12, 3 }
  0x23   : > { %v385_v6 = vmul.f32 %v1313_v3, %v1817_v4  ;;  %v386_v10 = vmul.f32 %v1313_v3, %v1825_v8  ;;  %v1830_v11 = vld [vmem:[%s1803_s23 + $0x28] sm:$0xff]  ;;  %v1833_v12 = vld [vmem:[%s1803_s23 + $0x20] sm:$0xff]  ;;  %v1845_v20 = vld [vmem:[%s1803_s23 + $0x30] sm:$0xff]  ;;  %v392_v23 = vmul.f32 %v1313_v3, %v1842_v19  ;;  %vm597_vm5 = vcmask 516096  }
  0x24   : > { %v400_v13 = vsel %vm393_vm2, %v387_v5, 0.0  ;;  %v403_v15 = vsel %vm393_vm2, %v388_v9, 0.0  ;;  %v390_v17 = vmul.f32 %v1313_v3, %v1830_v11  ;;  %v389_v18 = vmul.f32 %v1313_v3, %v1833_v12  ;;  %v1316_v25 = vld [vmem:[%s2199_s1 + $0x1] ss:$0 sm:$0xff]  ;;  %v1314_v49 = vld [vmem:[%s2200_s2] ss:$0 sm:$0xff] }
  0x25   : > { %v394_v14 = vsel %vm393_vm2, %v385_v6, 0.0  ;;  %401 = vadd.xlane.f32.xlu1 %v400_v13  ;;  %v397_v16 = vsel %vm393_vm2, %v386_v10, 0.0  ;;  %v391_v24 = vmul.f32 %v1313_v3, %v1845_v20  ;;  %v415_v26 = vsel %vm393_vm2, %v392_v23, 0.0 }
  0x26   : > { %395 = vadd.xlane.f32.xlu0 %v394_v14  ;;  %v409_v21 = vsel %vm393_vm2, %v390_v17, 0.0  ;;  %v406_v22 = vsel %vm393_vm2, %v389_v18, 0.0  ;;  %v609_v28 = vmul.f32 %v1316_v25, %v1825_v8  ;;  %v608_v29 = vmul.f32 %v1316_v25, %v1817_v4 }
  0x27   : > { %v412_v27 = vsel %vm393_vm2, %v391_v24, 0.0  ;;  %v611_v32 = vmul.f32 %v1316_v25, %v1822_v7  ;;  %v610_v33 = vmul.f32 %v1316_v25, %v1811_v2  ;;  %v613_v36 = vmul.f32 %v1316_v25, %v1830_v11 }
  0x28   : > { %v619_v30 = vsel %vm393_vm2, %v609_v28, 0.0  ;;  %v616_v31 = vsel %vm393_vm2, %v608_v29, 0.0  ;;  %v612_v37 = vmul.f32 %v1316_v25, %v1833_v12  ;;  %v615_v40 = vmul.f32 %v1316_v25, %v1842_v19 }
  0x29   : > { %404 = vadd.xlane.f32.xlu1 %v403_v15  ;;  %v625_v34 = vsel %vm393_vm2, %v611_v32, 0.0  ;;  %v622_v35 = vsel %vm393_vm2, %v610_v33, 0.0  ;;  %v631_v38 = vsel %vm393_vm2, %v613_v36, 0.0  ;;  %v614_v41 = vmul.f32 %v1316_v25, %v1845_v20 }
  0x2a   : > { %398 = vadd.xlane.f32.xlu0 %v397_v16  ;;  %v628_v39 = vsel %vm393_vm2, %v612_v37, 0.0  ;;  %v637_v42 = vsel %vm393_vm2, %v615_v40, 0.0  ;;  %v461_v25 = vlaneseq  ;;  %vm1674_vm6 = vmmov (!%p1319_p1), 0  }
  0x2b   : > { %v634_v43 = vsel %vm393_vm2, %v614_v41, 0.0  ;;  %vm923_vm7 = vcmask (!%p1319_p1), 122880   ;;  %vm946_vm8 = vcmask (!%p1319_p1), 130048  }
  0x2d   : > { %410 = vadd.xlane.f32.xlu1 %v409_v21 }
  0x2e   : > { %407 = vadd.xlane.f32.xlu0 %v406_v22 }
  0x31   : > { %416 = vadd.xlane.f32.xlu1 %v415_v26 }
  0x32   : > { %413 = vadd.xlane.f32.xlu0 %v412_v27  ;;  %v1318_v27 = vld [vmem:[%s2200_s2 + $0x1] ss:$0 sm:$0xff] }
  0x35   : > { %620 = vadd.xlane.f32.xlu1 %v619_v30 }
  0x36   : > { %617 = vadd.xlane.f32.xlu0 %v616_v31  ;;  %v462_v31 = vshrl.u32 %v461_v25, 7 }
  0x39   : > { %626 = vadd.xlane.f32.xlu1 %v625_v34 }
  0x3a   : > { %623 = vadd.xlane.f32.xlu0 %v622_v35 }
  0x3d   : > { %632 = vadd.xlane.f32.xlu1 %v631_v38 }
  0x3e   : > { %629 = vadd.xlane.f32.xlu0 %v628_v39 }
  0x41   : > { %638 = vadd.xlane.f32.xlu1 %v637_v42  ;;  %v1922_v42 = vsub.s32 0, %v462_v31 }
  0x42   : > { %635 = vadd.xlane.f32.xlu0 %v634_v43 }
  0xb2   : > { %v402_v45 = vpop.xlane.xlu1 %401 }
  0xb3   : > { %v396_v46 = vpop.xlane.xlu0 %395  ;;  %v1883_v56 = vadd.f32 %v1314_v49, %v402_v45 }
  0xb4   : > { %v1875_v52 = vadd.f32 %v1314_v49, %v396_v46 }
  0xb5   : > { %v437_v6 = vsel %vm434_vm3, %v1883_v56, -inf }
  0xb6   : > { %v405_v47 = vpop.xlane.xlu1 %404  ;;  %v435_v62 = vsel %vm434_vm3, %v1875_v52, -inf }
  0xb7   : > { %v399_v48 = vpop.xlane.xlu0 %398  ;;  %v1885_v57 = vadd.f32 %v1314_v49, %v405_v47 }
  0xb8   : > { %v1877_v53 = vadd.f32 %v1314_v49, %v399_v48 }
  0xb9   : > { %v438_v9 = vsel %vm434_vm3, %v1885_v57, -inf }
  0xba   : > { %v411_v50 = vpop.xlane.xlu1 %410  ;;  %v436_v63 = vsel %vm434_vm3, %v1877_v53, -inf }
  0xbb   : > { %v408_v51 = vpop.xlane.xlu0 %407  ;;  %v1879_v54 = vadd.f32 %v1314_v49, %v411_v50 }
  0xbc   : > { %v1881_v55 = vadd.f32 %v1314_v49, %v408_v51 }
  0xbd   : > { %v441_v58 = vsel %vm434_vm3, %v1879_v54, -inf }
  0xbe   : > { %v439_v59 = vsel %vm434_vm3, %v1881_v55, -inf  ;;  %v417_v60 = vpop.xlane.xlu1 %416  ;;  %v442_v3 = vmax.f32 %v436_v63, %v441_v58 }
  0xbf   : > { %v414_v61 = vpop.xlane.xlu0 %413  ;;  %v1895_v0 = vadd.f32 %v1314_v49, %v417_v60  ;;  %v440_v5 = vmax.f32 %v435_v62, %v439_v59 }
  0xc0   : > { %v1897_v1 = vadd.f32 %v1314_v49, %v414_v61  ;;  %v433_v49 = vld [vmem:[#allocation2] sm:$0x1] }
  0xc1   : > { %v445_v10 = vsel %vm434_vm3, %v1895_v0, -inf  ;;  %v447_v18 = vmax.f32 %v440_v5, %v442_v3 }
  0xc2   : > { %v443_v13 = vsel %vm434_vm3, %v1897_v1, -inf  ;;  %v446_v14 = vmax.f32 %v438_v9, %v445_v10  ;;  %v621_v16 = vpop.xlane.xlu1 %620 }
  0xc3   : > { %v444_v15 = vmax.f32 %v437_v6, %v443_v13  ;;  %v618_v17 = vpop.xlane.xlu0 %617  ;;  %v1910_v33 = vadd.f32 %v1318_v27, %v621_v16 }
  0xc4   : > { %v1920_v39 = vadd.f32 %v1318_v27, %v618_v17 }
  0xc5   : > { %v448_v21 = vmax.f32 %v444_v15, %v446_v14  ;;  %v659_v46 = vsel %vm434_vm3, %v1910_v33, -inf }
  0xc6   : > { %v627_v23 = vpop.xlane.xlu1 %626  ;;  %v658_v61 = vsel %vm434_vm3, %v1920_v39, -inf }
  0xc7   : > { %v449_v22 = vmax.f32 %v447_v18, %v448_v21  ;;  %v624_v24 = vpop.xlane.xlu0 %623  ;;  %v1916_v36 = vadd.f32 %v1318_v27, %v627_v23 }
  0xc8   : > { %v1918_v37 = vadd.f32 %v1318_v27, %v624_v24 }
  0xc9   : > { %v450_v26 = vrot.slane %v449_v22, 4  ;;  %v661_v50 = vsel %vm434_vm3, %v1916_v36, -inf }
  0xca   : > { %v633_v29 = vpop.xlane.xlu1 %632  ;;  %v660_v51 = vsel %vm434_vm3, %v1918_v37, -inf }
  0xcb   : > { %v451_v28 = vmax.f32 %v449_v22, %v450_v26  ;;  %v630_v30 = vpop.xlane.xlu0 %629  ;;  %v1912_v34 = vadd.f32 %v1318_v27, %v633_v29 }
  0xcc   : > { %v1914_v35 = vadd.f32 %v1318_v27, %v630_v30 }
  0xcd   : > { %v452_v32 = vrot.slane %v451_v28, 2  ;;  %v664_v47 = vsel %vm434_vm3, %v1912_v34, -inf }
  0xce   : > { %v639_v40 = vpop.xlane.xlu1 %638  ;;  %v662_v48 = vsel %vm434_vm3, %v1914_v35, -inf  ;;  %v665_v3 = vmax.f32 %v659_v46, %v664_v47 }
  0xcf   : > { %v453_v38 = vmax.f32 %v451_v28, %v452_v32  ;;  %v636_v41 = vpop.xlane.xlu0 %635  ;;  %v1924_v43 = vadd.f32 %v1318_v27, %v639_v40  ;;  %v663_v5 = vmax.f32 %v658_v61, %v662_v48 }
  0xd0   : > { %v1926_v44 = vadd.f32 %v1318_v27, %v636_v41  ;;  %v657_v41 = vld [vmem:[#allocation2 + $0x1] sm:$0x1] }
  0xd1   : > { %v454_v45 = vrot.slane %v453_v38, 1  ;;  %v668_v58 = vsel %vm434_vm3, %v1924_v43, -inf  ;;  %v670_v14 = vmax.f32 %v663_v5, %v665_v3 }
  0xd2   : > { %v666_v59 = vsel %vm434_vm3, %v1926_v44, -inf  ;;  %v669_v62 = vmax.f32 %v661_v50, %v668_v58 }
  0xd3   : > { %v455_v60 = vmax.f32 %v453_v38, %v454_v45  ;;  %v667_v63 = vmax.f32 %v660_v51, %v666_v59 }
  0xd5   : > { %v456_v6 = vmax.f32 %v433_v49, %v455_v60  ;;  %v671_v9 = vmax.f32 %v667_v63, %v669_v62 }
  0xd7   : > { %v457_v10 = vsub.f32 %v433_v49, %v456_v6  ;;  %v464_v13 = vrot.slane %v456_v6, %v1922_v42  ;;  %599 = vst.msk [vmem:[#allocation2] sm:$0x1] %vm514_vm4, %v456_v6  ;;  %v672_v23 = vmax.f32 %v670_v14, %v671_v9 }
  0xd9   : > { %v458_v15 = vmul.f32 1.442695, %v457_v10  ;;  %v466_v16 = vsub.f32 %v1875_v52, %v464_v13  ;;  %v467_v17 = vsub.f32 %v1877_v53, %v464_v13  ;;  %v468_v18 = vsub.f32 %v1883_v56, %v464_v13 }
  0xda   : > { %v469_v21 = vsub.f32 %v1885_v57, %v464_v13  ;;  %v470_v22 = vsub.f32 %v1881_v55, %v464_v13  ;;  %v471_v26 = vsub.f32 %v1879_v54, %v464_v13  ;;  %v472_v52 = vsub.f32 %v1897_v1, %v464_v13 }
  0xdb   : > { %1527 = vpow2.f32 %v458_v15  ;;  %v474_v24 = vmul.f32 1.442695, %v466_v16  ;;  %v476_v25 = vmul.f32 1.442695, %v467_v17  ;;  %v478_v27 = vmul.f32 1.442695, %v468_v18 }
  0xdc   : > { %v480_v28 = vmul.f32 1.442695, %v469_v21  ;;  %v482_v29 = vmul.f32 1.442695, %v470_v22  ;;  %v673_v53 = vrot.slane %v672_v23, 4  ;;  %v473_v56 = vsub.f32 %v1895_v0, %v464_v13 }
  0xdd   : > { %1529 = vpow2.f32 %v474_v24  ;;  %v484_v57 = vmul.f32 1.442695, %v471_v26  ;;  %v486_v30 = vmul.f32 1.442695, %v472_v52 }
  0xde   : > { %1531 = vpow2.f32 %v476_v25  ;;  %v674_v55 = vmax.f32 %v672_v23, %v673_v53  ;;  %v488_v32 = vmul.f32 1.442695, %v473_v56 }
  0xdf   : > { %1533 = vpow2.f32 %v478_v27 }
  0xe0   : > { %1535 = vpow2.f32 %v480_v28  ;;  %v675_v31 = vrot.slane %v674_v55, 2 }
  0xe1   : > { %1537 = vpow2.f32 %v482_v29 }
  0xe2   : > { %1539 = vpow2.f32 %v484_v57  ;;  %v676_v54 = vmax.f32 %v674_v55, %v675_v31 }
  0xe3   : > { %1541 = vpow2.f32 %v486_v30 }
  0xe4   : > { %v677_v40 = vrot.slane %v676_v54, 1  ;;  %1543 = vpow2.f32 %v488_v32 }
  0xe5   : > { %v1954_v38 = vpop.eup %1527 }
  0xe6   : > { %519 = vperm.xlu0 %1525, %v1954_v38   ;;  %v678_v46 = vmax.f32 %v676_v54, %v677_v40 }
  0xe7   : > { %v1530_v1 = vpop.eup %1529 }
  0xe8   : > { %v1532_v45 = vpop.eup %1531  ;;  %v492_v0 = vsel %vm434_vm3, %v1530_v1, 0.0  ;;  %529 = vperm.xlu1 %1526, %v1530_v1   ;;  %v679_v51 = vmax.f32 %v657_v41, %v678_v46  ;;  %v490_v1 = vld [vmem:[#allocation3] sm:$0x1] }
  0xe9   : > { %v1958_v47 = vpop.eup %1533  ;;  %v493_v48 = vsel %vm434_vm3, %v1532_v45, 0.0 }
  0xea   : > { %v1961_v49 = vpop.eup %1535  ;;  %v494_v50 = vadd.f32 %v493_v48, %v492_v0  ;;  %v495_v59 = vsel %vm434_vm3, %v1958_v47, 0.0  ;;  %v680_v61 = vsub.f32 %v657_v41, %v679_v51  ;;  %v687_v62 = vrot.slane %v679_v51, %v1922_v42  ;;  %822 = vst.msk [vmem:[#allocation2 + $0x1] sm:$0x1] %vm514_vm4, %v679_v51 }
  0xeb   : > { %v1538_v58 = vpop.eup %1537  ;;  %v497_v63 = vsel %vm434_vm3, %v1961_v49, 0.0  ;;  %v491_v51 = vmul.f32 %v1954_v38, %v490_v1 }
  0xec   : > { %v496_v60 = vadd.f32 %v495_v59, %v494_v50  ;;  %549 = vperm.xlu0 %1525, %v1538_v58   ;;  %534 = vperm.xlu1 %1526, %v1532_v45   ;;  %v1540_v3 = vpop.eup %1539  ;;  %v681_v6 = vmul.f32 1.442695, %v680_v61  ;;  %v689_v9 = vsub.f32 %v1920_v39, %v687_v62  ;;  %v499_v10 = vsel %vm434_vm3, %v1538_v58, 0.0 }
  0xed   : > { %v690_v13 = vsub.f32 %v1910_v33, %v687_v62  ;;  %v691_v14 = vsub.f32 %v1918_v37, %v687_v62  ;;  %v692_v15 = vsub.f32 %v1916_v36, %v687_v62  ;;  %v1542_v16 = vpop.eup %1541  ;;  %v693_v18 = vsub.f32 %v1914_v35, %v687_v62 }
  0xee   : > { %v498_v5 = vadd.f32 %v497_v63, %v496_v60  ;;  %v501_v21 = vsel %vm434_vm3, %v1540_v3, 0.0  ;;  %1545 = vpow2.f32 %v681_v6  ;;  %v697_v22 = vmul.f32 1.442695, %v689_v9  ;;  %v1544_v24 = vpop.eup %1543 }
  0xef   : > { %v699_v23 = vmul.f32 1.442695, %v690_v13  ;;  %v694_v25 = vsub.f32 %v1912_v34, %v687_v62  ;;  %v701_v26 = vmul.f32 1.442695, %v691_v14  ;;  %v703_v33 = vmul.f32 1.442695, %v692_v15 }
  0xf0   : > { %v500_v17 = vadd.f32 %v499_v10, %v498_v5  ;;  %554 = vperm.xlu0 %1525, %v1540_v3   ;;  %v503_v37 = vsel %vm434_vm3, %v1542_v16, 0.0  ;;  %1547 = vpow2.f32 %v697_v22  ;;  %v695_v27 = vsub.f32 %v1926_v44, %v687_v62 }
  0xf1   : > { %1549 = vpow2.f32 %v699_v23  ;;  %v705_v35 = vmul.f32 1.442695, %v693_v18  ;;  %v505_v28 = vsel %vm434_vm3, %v1544_v24, 0.0  ;;  %v696_v52 = vsub.f32 %v1924_v43, %v687_v62  ;;  %v714_v23 = vld [vmem:[#allocation3 + $0x1] sm:$0x1] }
  0xf2   : > { %v502_v39 = vadd.f32 %v501_v21, %v500_v17  ;;  %1551 = vpow2.f32 %v701_v26  ;;  %v707_v53 = vmul.f32 1.442695, %v694_v25  ;;  %v709_v56 = vmul.f32 1.442695, %v695_v27 }
  0xf3   : > { %1553 = vpow2.f32 %v703_v33  ;;  %v711_v55 = vmul.f32 1.442695, %v696_v52 }
  0xf4   : > { %v504_v36 = vadd.f32 %v503_v37, %v502_v39  ;;  %559 = vperm.xlu0 %1525, %v1542_v16   ;;  %1555 = vpow2.f32 %v705_v35 }
  0xf5   : > { %1557 = vpow2.f32 %v707_v53 }
  0xf6   : > { %v506_v29 = vadd.f32 %v505_v28, %v504_v36  ;;  %1559 = vpow2.f32 %v709_v56 }
  0xf7   : > { %1561 = vpow2.f32 %v711_v55 }
  0xf8   : > { %v507_v34 = vrot.slane %v506_v29, 4  ;;  %564 = vperm.xlu0 %1525, %v1544_v24   ;;  %v1546_v30 = vpop.eup %1545 }
  0xf9   : > { %v715_v24 = vmul.f32 %v1546_v30, %v714_v23 }
  0xfa   : > { %v508_v57 = vadd.f32 %v507_v34, %v506_v29  ;;  %v1548_v31 = vpop.eup %1547 }
  0xfb   : > { %v1550_v32 = vpop.eup %1549  ;;  %v716_v40 = vsel %vm434_vm3, %v1548_v31, 0.0  ;;  %753 = vperm.xlu1 %1526, %v1548_v31  }
  0xfc   : > { %v509_v44 = vrot.slane %v508_v57, 2  ;;  %743 = vperm.xlu0 %1525, %v1546_v30   ;;  %v1552_v43 = vpop.eup %1551  ;;  %v717_v41 = vsel %vm434_vm3, %v1550_v32, 0.0 }
  0xfd   : > { %v1554_v45 = vpop.eup %1553  ;;  %v718_v46 = vadd.f32 %v717_v41, %v716_v40  ;;  %v719_v48 = vsel %vm434_vm3, %v1552_v43, 0.0 }
  0xfe   : > { %v510_v54 = vadd.f32 %v509_v44, %v508_v57  ;;  %v1556_v50 = vpop.eup %1555  ;;  %v721_v60 = vsel %vm434_vm3, %v1554_v45, 0.0 }
  0xff   : > { %v720_v59 = vadd.f32 %v719_v48, %v718_v46  ;;  %758 = vperm.xlu1 %1526, %v1550_v32   ;;  %v1558_v61 = vpop.eup %1557  ;;  %v723_v3 = vsel %vm434_vm3, %v1556_v50, 0.0 }
 0x100   : > { %v511_v0 = vrot.slane %v510_v54, 1  ;;  %v1560_v5 = vpop.eup %1559  ;;  %v725_v9 = vsel %vm434_vm3, %v1558_v61, 0.0 }
 0x101   : > { %v722_v63 = vadd.f32 %v721_v60, %v720_v59  ;;  %v1562_v10 = vpop.eup %1561  ;;  %v727_v13 = vsel %vm434_vm3, %v1560_v5, 0.0 }
 0x102   : > { %v512_v58 = vadd.f32 %v511_v0, %v510_v54  ;;  %v729_v15 = vsel %vm434_vm3, %v1562_v10, 0.0 }
 0x103   : > { %v724_v6 = vadd.f32 %v723_v3, %v722_v63  ;;  %539 = vperm.xlu1 %1526, %v1958_v47  }
 0x104   : > { %v513_v62 = vadd.f32 %v512_v58, %v491_v51 }
 0x105   : > { %v726_v38 = vadd.f32 %v725_v9, %v724_v6 }
 0x106   : > { %515 = vst.msk [vmem:[#allocation3] sm:$0x1] %vm514_vm4, %v513_v62 }
 0x107   : > { %v728_v14 = vadd.f32 %v727_v13, %v726_v38  ;;  %763 = vperm.xlu1 %1526, %v1552_v43  }
 0x109   : > { %v730_v16 = vadd.f32 %v729_v15, %v728_v14 }
 0x10b   : > { %v731_v17 = vrot.slane %v730_v16, 4  ;;  %544 = vperm.xlu1 %1526, %v1961_v49  }
 0x10d   : > { %v732_v18 = vadd.f32 %v731_v17, %v730_v16 }
 0x10f   : > { %v733_v21 = vrot.slane %v732_v18, 2  ;;  %768 = vperm.xlu1 %1526, %v1554_v45  }
 0x111   : > { %v734_v22 = vadd.f32 %v733_v21, %v732_v18 }
 0x113   : > { %v735_v47 = vrot.slane %v734_v22, 1  ;;  %773 = vperm.xlu1 %1526, %v1556_v50  }
 0x115   : > { %v736_v39 = vadd.f32 %v735_v47, %v734_v22 }
 0x117   : > { %v737_v25 = vadd.f32 %v736_v39, %v715_v24  ;;  %778 = vperm.xlu1 %1526, %v1558_v61  }
 0x119   : > { %738 = vst.msk [vmem:[#allocation3 + $0x1] sm:$0x1] %vm514_vm4, %v737_v25 }
 0x11b   : > { %783 = vperm.xlu1 %1526, %v1560_v5  }
 0x11f   : > { %788 = vperm.xlu1 %1526, %v1562_v10  }
 0x165   : > { %v1994_v33 = vpop.permute.xlu0 %519 }
 0x167   : > { %v530_v26 = vpop.permute.xlu1 %529 }
 0x168   : > { %v567_v52 = vmul.f32 %v530_v26, %v1817_v4  ;;  %v525_v26 = vrot.slane %v1994_v33, %v1922_v42 }
 0x16a   : > { %v575_v55 = vsel %vm393_vm2, %v567_v52, 0.0 }
 0x16b   : > { %v535_v37 = vpop.permute.xlu1 %534  ;;  %v550_v36 = vpop.permute.xlu0 %549 }
 0x16c   : > { %v568_v29 = vmul.f32 %v535_v37, %v1825_v8  ;;  %v571_v32 = vmul.f32 %v550_v36, %v1833_v12  ;;  %v516_v36 = vld [vmem:[#allocation4] sm:$0x1] }
 0x16d   : > { %v526_v52 = vmul.f32 %v525_v26, %v516_v36  ;;  %v938_v26 = vld [vmem:[%s2203_s5] sm:$0x1] (!%p1319_p1) }
 0x16e   : > { %v576_v56 = vsel %vm393_vm2, %v568_v29, 0.0  ;;  %v582_v46 = vsel %vm393_vm2, %v571_v32, 0.0  ;;  %v1322_v36 = vld [vmem:[%s2201_s3 + $0x40] sm:$0xff] (!%p1319_p1) }
 0x16f   : > { %v555_v35 = vpop.permute.xlu0 %554  ;;  %v577_v44 = vadd.f32 %v576_v56, %v575_v55 }
 0x170   : > { %v572_v43 = vmul.f32 %v555_v35, %v1830_v11 }
 0x172   : > { %v584_v58 = vsel %vm393_vm2, %v572_v43, 0.0  ;;  %v828_v43 = vld [vmem:[#allocation3] sm:$0x1] (!%p1319_p1) }
 0x173   : > { %v560_v57 = vpop.permute.xlu0 %559 }
 0x174   : > { %v573_v48 = vmul.f32 %v560_v57, %v1845_v20 }
 0x176   : > { %v586_v3 = vsel %vm393_vm2, %v573_v48, 0.0  ;;  %v843_v48 = vld [vmem:[%s2201_s3 + $0x10] sm:$0xff] (!%p1319_p1) }
 0x177   : > { %v565_v41 = vpop.permute.xlu0 %564 }
 0x178   : > { %v574_v59 = vmul.f32 %v565_v41, %v1842_v19  ;;  %v842_v41 = vld [vmem:[%s2201_s3 + $0x8] sm:$0xff] (!%p1319_p1) }
 0x17a   : > { %v754_v49 = vpop.permute.xlu1 %753 }
 0x17b   : > { %v791_v60 = vmul.f32 %v754_v49, %v1817_v4  ;;  %v744_v33 = vpop.permute.xlu0 %743 }
 0x17d   : > { %v799_v10 = vsel %vm393_vm2, %v791_v60, 0.0  ;;  %v1675_v60 = vmov (!%p1319_p1), 0.0  }
 0x17e   : > { %v759_v27 = vpop.permute.xlu1 %758  ;;  %1381 = vmatprep.mubr.msk.f32.mxu0 (!%p1319_p1), %vm1674_vm6, %v1675_v60  ;;  %1388 = vmatprep.mubr.msk.f32.mxu1 (!%p1319_p1), %vm1674_vm6, %v1675_v60 }
 0x17f   : > { %v792_v50 = vmul.f32 %v759_v27, %v1825_v8  ;;  %v588_v8 = vsel %vm393_vm2, %v574_v59, 0.0  ;;  %v846_v59 = vld [vmem:[%s2201_s3 + $0x28] sm:$0xff] (!%p1319_p1) }
 0x181   : > { %v800_v5 = vsel %vm393_vm2, %v792_v50, 0.0  ;;  %v844_v50 = vld [vmem:[%s2201_s3 + $0x18] sm:$0xff] (!%p1319_p1) }
 0x182   : > { %v540_v28 = vpop.permute.xlu1 %539  ;;  %v801_v4 = vadd.f32 %v800_v5, %v799_v10 }
 0x183   : > { %v569_v53 = vmul.f32 %v540_v28, %v1811_v2 }
 0x185   : > { %v578_v30 = vsel %vm393_vm2, %v569_v53, 0.0 }
 0x186   : > { %v764_v34 = vpop.permute.xlu1 %763  ;;  %v579_v40 = vadd.f32 %v578_v30, %v577_v44  ;;  %v749_v30 = vrot.slane %v744_v33, %v1922_v42  ;;  %v1328_v33 = vld [vmem:[%s2201_s3 + $0x70] sm:$0xff] (!%p1319_p1) }
 0x187   : > { %v793_v61 = vmul.f32 %v764_v34, %v1811_v2 }
 0x189   : > { %v802_v38 = vsel %vm393_vm2, %v793_v61, 0.0 }
 0x18a   : > { %v545_v31 = vpop.permute.xlu1 %544  ;;  %v803_v17 = vadd.f32 %v802_v38, %v801_v4  ;;  %v849_v38 = vld [vmem:[%s2202_s4] sm:$0x1] (!%p1319_p1) }
 0x18b   : > { %v570_v54 = vmul.f32 %v545_v31, %v1822_v7  ;;  %v740_v31 = vld [vmem:[#allocation4 + $0x1] sm:$0x1] }
 0x18c   : > { %v750_v32 = vmul.f32 %v749_v30, %v740_v31 }
 0x18d   : > { %v580_v1 = vsel %vm393_vm2, %v570_v54, 0.0 }
 0x18e   : > { %v581_v45 = vadd.f32 %v580_v1, %v579_v40  ;;  %v769_v0 = vpop.permute.xlu1 %768  ;;  %v841_v1 = vld [vmem:[%s2201_s3] sm:$0xff] (!%p1319_p1) }
 0x18f   : > { %v794_v6 = vmul.f32 %v769_v0, %v1822_v7  ;;  %v1673_v0 = vmov (!%p1319_p1), 0.0|0.0  }
 0x190   : > { %v583_v51 = vadd.f32 %v582_v46, %v581_v45  ;;  %v1672_v45 = vmov (!%p1319_p1), 0   ;;  %1417 = vmatprep.subr.bf16.mxu0 (!%p1319_p1), %v1673_v0  ;;  %v1418_v46 = vpack.c.bf16 (!%p1319_p1), %v842_v41, %v841_v1  ;;  %1429 = vmatprep.subr.bf16.mxu1 (!%p1319_p1), %v1673_v0 }
 0x191   : > { %v804_v15 = vsel %vm393_vm2, %v794_v6, 0.0  ;;  %1563 = vset.pattern.permute.xlu0 (!%p1319_p1), %v1672_v45  ;;  %1564 = vset.pattern.permute.xlu1 (!%p1319_p1), %v1672_v45 }
 0x192   : > { %v585_v62 = vadd.f32 %v584_v58, %v583_v51  ;;  %v774_v63 = vpop.permute.xlu1 %773  ;;  %v805_v22 = vadd.f32 %v804_v15, %v803_v17  ;;  %831 = vperm.xlu0 (!%p1319_p1), %1563, %v828_v43   ;;  %1419 = vmatpush3.bf16.msra.mxu0 (!%p1319_p1), %v1418_v46  ;;  %v1421_v51 = vpack.c.bf16 (!%p1319_p1), %v844_v50, %v843_v48  ;;  %v845_v58 = vld [vmem:[%s2201_s3 + $0x20] sm:$0xff] (!%p1319_p1) }
 0x193   : > { %v795_v13 = vmul.f32 %v774_v63, %v1833_v12  ;;  %1420 = vmatprep.subr.bf16.mxu0 (!%p1319_p1), %v1673_v0  ;;  %v1424_v61 = vpack.c.bf16 (!%p1319_p1), %v846_v59, %v845_v58  ;;  %v848_v63 = vld [vmem:[%s2201_s3 + $0x38] sm:$0xff] (!%p1319_p1) }
 0x194   : > { %v587_v9 = vadd.f32 %v586_v3, %v585_v62  ;;  %v847_v62 = vld [vmem:[%s2201_s3 + $0x30] sm:$0xff] (!%p1319_p1) }
 0x195   : > { %v806_v7 = vsel %vm393_vm2, %v795_v13, 0.0  ;;  %v1427_v3 = vpack.c.bf16 (!%p1319_p1), %v848_v63, %v847_v62  ;;  %v1334_v62 = vld [vmem:[%s2205_s7 + $0x10] sm:$0xff] (!%p1319_p1)  ;;  %v1335_v63 = vld [vmem:[%s2205_s7 + $0x18] sm:$0xff] (!%p1319_p1) }
 0x196   : > { %v589_v14 = vadd.f32 %v588_v8, %v587_v9  ;;  %v779_v2 = vpop.permute.xlu1 %778  ;;  %v807_v12 = vadd.f32 %v806_v7, %v805_v22  ;;  %1422 = vmatpush3.bf16.msra.mxu0 (!%p1319_p1), %v1421_v51  ;;  %v944_v22 = vld [vmem:[%s2205_s7 + $0x8] sm:$0xff] (!%p1319_p1) }
 0x197   : > { %v796_v16 = vmul.f32 %v779_v2, %v1830_v11  ;;  %1423 = vmatprep.subr.bf16.mxu0 (!%p1319_p1), %v1673_v0 }
 0x198   : > { %v590_v18 = vrot.slane %v589_v14, 4 }
 0x199   : > { %v808_v47 = vsel %vm393_vm2, %v796_v16, 0.0 }
 0x19a   : > { %v591_v21 = vadd.f32 %v590_v18, %v589_v14  ;;  %v784_v23 = vpop.permute.xlu1 %783  ;;  %v809_v11 = vadd.f32 %v808_v47, %v807_v12  ;;  %1425 = vmatpush3.bf16.msra.mxu0 (!%p1319_p1), %v1424_v61  ;;  %v1022_v47 = vld [vmem:[#allocation3 + $0x1] sm:$0x1] (!%p1319_p1) }
 0x19b   : > { %v797_v24 = vmul.f32 %v784_v23, %v1845_v20  ;;  %1426 = vmatprep.subr.bf16.mxu0 (!%p1319_p1), %v1673_v0 }
 0x19c   : > { %v592_v39 = vrot.slane %v591_v21, 2 }
 0x19d   : > { %v810_v25 = vsel %vm393_vm2, %v797_v24, 0.0 }
 0x19e   : > { %v593_v37 = vadd.f32 %v592_v39, %v591_v21  ;;  %v789_v49 = vpop.permute.xlu1 %788  ;;  %v811_v28 = vadd.f32 %v810_v25, %v809_v11  ;;  %1428 = vmatpush3.bf16.msra.mxu0 (!%p1319_p1), %v1427_v3  ;;  %v943_v21 = vld [vmem:[%s2205_s7] sm:$0xff] (!%p1319_p1)  ;;  %v1445_v3 = vpack.c.bf16 (!%p1319_p1), %v1335_v63, %v1334_v62 }
 0x19f   : > { %v798_v27 = vmul.f32 %v789_v49, %v1842_v19  ;;  %1444 = vmatprep.subr.bf16.mxu0 (!%p1319_p1), %v1673_v0  ;;  %v1430_v23 = vpack.c.bf16 (!%p1319_p1), %v944_v22, %v943_v21  ;;  %v940_v11 = vld [vmem:[%s2204_s6] sm:$0x1] (!%p1319_p1) }
 0x1a0   : > { %v594_v35 = vrot.slane %v593_v37, 1 }
 0x1a1   : > { %v812_v29 = vsel %vm393_vm2, %v798_v27, 0.0  ;;  %1431 = vmatpush3.bf16.msra.mxu1 (!%p1319_p1), %v1430_v23  ;;  %v1323_v27 = vld [vmem:[%s2201_s3 + $0x48] sm:$0xff] (!%p1319_p1) }
 0x1a2   : > { %v595_v53 = vadd.f32 %v594_v35, %v593_v37  ;;  %v813_v20 = vadd.f32 %v812_v29, %v811_v28  ;;  %1432 = vmatprep.subr.bf16.mxu1 (!%p1319_p1), %v1673_v0  ;;  %v1433_v28 = vpack.c.bf16 (!%p1319_p1), %v1323_v27, %v1322_v36 }
 0x1a4   : > { %v596_v34 = vadd.f32 %v595_v53, %v526_v52  ;;  %v814_v56 = vrot.slane %v813_v20, 4  ;;  %v1324_v52 = vld [vmem:[%s2201_s3 + $0x50] sm:$0xff] (!%p1319_p1)  ;;  %v1325_v53 = vld [vmem:[%s2201_s3 + $0x58] sm:$0xff] (!%p1319_p1) }
 0x1a6   : > { %598 = vst.msk [vmem:[#allocation4] sm:$0x1] %vm597_vm5, %v596_v34  ;;  %v815_v57 = vadd.f32 %v814_v56, %v813_v20  ;;  %v1436_v20 = vpack.c.bf16 (!%p1319_p1), %v1325_v53, %v1324_v52  ;;  %v1326_v34 = vld [vmem:[%s2201_s3 + $0x60] sm:$0xff] (!%p1319_p1)  ;;  %v1327_v56 = vld [vmem:[%s2201_s3 + $0x68] sm:$0xff] (!%p1319_p1) }
 0x1a8   : > { %v816_v55 = vrot.slane %v815_v57, 2 }
 0x1aa   : > { %v817_v44 = vadd.f32 %v816_v55, %v815_v57  ;;  %v1439_v57 = vpack.c.bf16 (!%p1319_p1), %v1327_v56, %v1326_v34  ;;  %v1329_v55 = vld [vmem:[%s2201_s3 + $0x78] sm:$0xff] (!%p1319_p1) }
 0x1ab   : > { %v1442_v30 = vpack.c.bf16 (!%p1319_p1), %v1329_v55, %v1328_v33 }
 0x1ac   : > { %v818_v19 = vrot.slane %v817_v44, 1  ;;  %826 = sbr.rel (%p1319_p1) target bundleno = 2036 (0x7f4), region = 64 }
 0x1ad   : > { %v827_v9 = vld [vmem:[#allocation4] sm:$0x1] (!%p1319_p1) }
 0x1ae   : > { %v819_v54 = vadd.f32 %v818_v19, %v817_v44 }
 0x1b0   : > { %v820_v40 = vadd.f32 %v819_v54, %v750_v32  ;;  %v945_v54 = vld [vmem:[%s2206_s8] sm:$0x1] (!%p1319_p1) }
 0x1b2   : > { %821 = vst.msk [vmem:[#allocation4 + $0x1] sm:$0x1] %vm597_vm5, %v820_v40 }
 0x1b9   : > { %v1021_v32 = vld [vmem:[#allocation4 + $0x1] sm:$0x1] }
 0x211   : > { %v832_v5 = vpop.permute.xlu0 %831 }
 0x212   : > { %v837_v6 = vrot.slane %v832_v5, %v1922_v42 }
 0x214   : > { %1565 = vrcp.f32 %v837_v6 }
 0x21e   : > { %v1566_v8 = vpop.eup %1565 }
 0x21f   : > { %v839_v10 = vmul.f32 %v1566_v8, %v827_v9 }
 0x221   : > { %1382 = vmatmul.mubr.msk.f32.vlgmr.msra.gmra.mrb[0].mxu0 %vm393_vm2, %v839_v10  ;;  %v1332_v10 = vld [vmem:[%s2203_s5 + $0x1] sm:$0x1] }
 0x222   : > { %1414 = vmatprep.mubr.msk.f32.mxu0 %vm1674_vm6, %v1675_v60  ;;  %1446 = vmatpush3.bf16.msra.mxu0 %v1445_v3 }
 0x2f4   : > { %v919_v13 = vpop.f32.mrb[0].mxu0 }
 0x2f5   : > { %v920_v4 = vadd.f32 %v919_v13, %v849_v38  ;;  %v1383_v14 = vpop.f32.mrb[1].mxu0  ;;  %v1333_v13 = vld [vmem:[%s2204_s6 + $0x1] sm:$0x1] }
 0x2f7   : > { %v924_v2 = vsel %vm923_vm7, %v920_v4, 0.0 }
 0x2f8   : > { %925 = vadd.xlane.f32.xlu0 %v924_v2 }
 0x385   : > { %v926_v15 = vpop.xlane.xlu0 %925 }
 0x386   : > { %v928_v16 = vmul.f32 0.0625, %v926_v15  ;;  %v1336_v15 = vld [vmem:[%s2206_s8 + $0x1] sm:$0x1] }
 0x388   : > { %v929_v17 = vsub.f32 %v920_v4, %v928_v16 }
 0x38a   : > { %v930_v18 = vmul.f32 %v929_v17, %v929_v17 }
 0x38c   : > { %v931_v7 = vsel %vm923_vm7, %v930_v18, 0.0 }
 0x38d   : > { %932 = vadd.xlane.f32.xlu1 %v931_v7 }
 0x39e   : > { %1025 = vperm.xlu1 %1564, %v1022_v47  }
 0x41a   : > { %v933_v24 = vpop.xlane.xlu1 %932 }
 0x41b   : > { %v934_v39 = vmul.f32 0.0625, %v933_v24 }
 0x41d   : > { %v935_v12 = vadd.f32 1e-05, %v934_v39 }
 0x41e   : > { %v1026_v44 = vpop.permute.xlu1 %1025 }
 0x41f   : > { %1567 = vrsqrt.f32 %v935_v12  ;;  %v1031_v31 = vrot.slane %v1026_v44, %v1922_v42 }
 0x421   : > { %1569 = vrcp.f32 %v1031_v31 }
 0x429   : > { %v1568_v25 = vpop.eup %1567 }
 0x42a   : > { %v937_v37 = vmul.f32 %v1568_v25, %v929_v17 }
 0x42b   : > { %v1570_v19 = vpop.eup %1569 }
 0x42c   : > { %v939_v49 = vmul.f32 %v938_v26, %v937_v37  ;;  %v1033_v40 = vmul.f32 %v1570_v19, %v1021_v32 }
 0x42e   : > { %v941_v35 = vadd.f32 %v940_v11, %v939_v49 }
 0x430   : > { %v942_v29 = vmax.f32 %v941_v35, 0.0 }
 0x432   : > { %1389 = vmatmul.mubr.msk.f32.vlgmr.msra.gmra.mrb[0].mxu1 %vm946_vm8, %v942_v29 }
 0x433   : > { %1434 = vmatpush3.bf16.msra.mxu1 %v1433_v28  ;;  %1407 = vmatprep.mubr.msk.f32.mxu1 %vm1674_vm6, %v1675_v60 }
 0x434   : > { %1435 = vmatprep.subr.bf16.mxu1 %v1673_v0 }
 0x437   : > { %1437 = vmatpush3.bf16.msra.mxu1 %v1436_v20 }
 0x438   : > { %1438 = vmatprep.subr.bf16.mxu1 %v1673_v0 }
 0x43b   : > { %1440 = vmatpush3.bf16.msra.mxu1 %v1439_v57 }
 0x43c   : > { %1441 = vmatprep.subr.bf16.mxu1 %v1673_v0  ;;  %v1330_v0 = vld [vmem:[%s2202_s4 + $0x1] sm:$0x1] }
 0x43f   : > { %1443 = vmatpush3.bf16.msra.mxu1 %v1442_v30 }
 0x505   : > { %v1016_v43 = vpop.f32.mrb[0].mxu1 }
 0x506   : > { %v1017_v1 = vadd.f32 %v1016_v43, %v945_v54  ;;  %v1390_v41 = vpop.f32.mrb[1].mxu1 }
 0x508   : > { %v1034_v45 = vadd.f32 %v1033_v40, %v1017_v1 }
 0x50a   : > { %1408 = vmatmul.mubr.msk.f32.vlgmr.msra.gmra.mrb[2].mxu1 %vm393_vm2, %v1034_v45 }
 0x5dd   : > { %v1115_v46 = vpop.f32.mrb[2].mxu1 }
 0x5de   : > { %v1116_v42 = vadd.f32 %v1330_v0, %v1115_v46  ;;  %v1409_v48 = vpop.f32.mrb[3].mxu1 }
 0x5e0   : > { %v1119_v50 = vsel %vm923_vm7, %v1116_v42, 0.0 }
 0x5e1   : > { %1120 = vadd.xlane.f32.xlu1 %v1119_v50 }
 0x66e   : > { %v1121_v51 = vpop.xlane.xlu1 %1120 }
 0x66f   : > { %v1122_v58 = vmul.f32 0.0625, %v1121_v51 }
 0x671   : > { %v1123_v59 = vsub.f32 %v1116_v42, %v1122_v58 }
 0x673   : > { %v1124_v60 = vmul.f32 %v1123_v59, %v1123_v59 }
 0x675   : > { %v1125_v61 = vsel %vm923_vm7, %v1124_v60, 0.0 }
 0x676   : > { %1126 = vadd.xlane.f32.xlu0 %v1125_v61 }
 0x703   : > { %v1127_v5 = vpop.xlane.xlu0 %1126 }
 0x704   : > { %v1128_v6 = vmul.f32 0.0625, %v1127_v5 }
 0x706   : > { %v1129_v9 = vadd.f32 1e-05, %v1128_v6 }
 0x708   : > { %1571 = vrsqrt.f32 %v1129_v9 }
 0x712   : > { %v1572_v8 = vpop.eup %1571 }
 0x713   : > { %v1131_v38 = vmul.f32 %v1572_v8, %v1123_v59 }
 0x715   : > { %v1134_v4 = vmul.f32 %v1332_v10, %v1131_v38 }
 0x717   : > { %v1137_v14 = vadd.f32 %v1333_v13, %v1134_v4 }
 0x719   : > { %v1138_v2 = vmax.f32 %v1137_v14, 0.0 }
 0x71b   : > { %1415 = vmatmul.mubr.msk.f32.vlgmr.msra.gmra.mrb[2].mxu0 %vm946_vm8, %v1138_v2 }
 0x7ee   : > { %v1213_v16 = vpop.f32.mrb[2].mxu0 }
 0x7ef   : > { %v1214_v17 = vadd.f32 %v1336_v15, %v1213_v16  ;;  %v1416_v18 = vpop.f32.mrb[3].mxu0 }
 0x7f1   : > { %v1217_v7 = vadd.f32 %v1214_v17, %v1017_v1 }
 0x7f3   : > { %1218 = vst.msk [vmem:[%s1807_s24] sm:$0x1] %vm597_vm5, %v1217_v7 }
 0x7f4 PF: > { %s1338_s27 = sshll.u32 %s1655_s13, 4  ;;  %s1232_s17 = sshll.u32 %s1807_s24, 4  ;;  %s1233_s17 = int_to_ptr.vmem [resolvable:$true] %s1232_s17 }
 0x7f5   : > { %s2148_s29 = scalar_lea.hbm %s2207_s9, %s1338_s27  ;;  %s1220_s18 = scalar_lea.sflag [#allocation6], %s346_s26 }
 0x7f6   : > { %s1573_s23 = scalar_lea.vmem %s1233_s17, 16  ;;  %s1676_s19 = smov [#allocation5]  }
 0x7f7   : > { %p1574_p2 = scmp.ne.s32.totalorder %s1233_s17, %s1573_s23  ;;  %s1577_s20 = sshll.u32 %s1676_s19, 4  ;;  %s1578_s20 = int_to_ptr.vmem [resolvable:$false] %s1577_s20 }
 0x7f8   : > { %s1579_s0 = scalar_lea.vmem %s1578_s20, 32  ;;  %p1580_p6 = scmp.lt.s32.totalorder %s1233_s17, %s1578_s20 }
 0x7f9   : > { %p1575_p4 = pnand %p1574_p2, %p1776_p3  ;;  %p1581_p7 = scmp.lt.s32.totalorder %s1579_s0, %s1573_s23 }
 0x7fb   : > { %p1576_p5 = pneg %p1575_p4  ;;  %p1582_p8 = por %p1581_p7, %p1580_p6 }
 0x7fd   : > { %p1583_p10 = pnand %p1582_p8, %p1576_p5 }
 0x7ff   : > { %1586 = shalt.err (!%p1583_p10)
}
 0x800   : > { %s1587_s13 = scalar_lea.hbm %s2148_s29, 16  ;;  %s1591_s27 = scalar_lea.hbm %s2207_s9, 32 }
 0x801   : > { %p1588_p11 = scmp.ne.s32.totalorder %s2148_s29, %s1587_s13  ;;  %p1592_p0 = scmp.lt.u32.totalorder %s2148_s29, %s2207_s9 }
 0x802   : > { %p1593_p1 = scmp.lt.u32.totalorder %s1591_s27, %s1587_s13  ;;  %p1595_p4 = scmp.lt.u32.totalorder %s1587_s13, %s2148_s29 }
 0x803   : > { %p1589_p12 = pnand %p1588_p11, %p1776_p3 }
 0x804   : > { %p1594_p2 = por %p1593_p1, %p1592_p0 }
 0x805   : > { %p1590_p13 = pneg %p1589_p12 }
 0x806   : > { %p1596_p5 = por %p1595_p4, %p1594_p2 }
 0x808   : > { %p1597_p6 = pnand %p1596_p5, %p1590_p13 }
 0x80a   : > { %1600 = shalt.err (!%p1597_p6)
}
 0x80b   : > { %1447 = dma.vmem_to_hbm [thread:$0]  (%p1776_p3), %s1233_s17, 16, %s2148_s29, %s1220_s18  }
 0x80c PF: > { %p1453_p7 = scmp.ge.s32.totalorder %s1667_s16, 2  ;;  %s1244_s0 = sand.u32 1, %s1639_s30  }
 0x80d   : > { %s1245_s23 = scalar_lea.sflag [#allocation6], %s1244_s0 }
 0x80e   : > { %p1450_p8 = pnand %p1453_p7, %p1786_p9 }
 0x810   : > { %1634 = dma.done.wait (!%p1450_p8), %s1245_s23, 16  }
 0x811   : > { %1636 = vsyncadd (!%p1450_p8), %s1245_s23, 4294967280  ;;  %s22_s16 = sadd.s32 1, %s1667_s16   ;;  %s2215_s21 = sld [smem:[#allocation8_spill]] }
 0x812   : > { %p19_p10 = scmp.ge.s32.totalorder %s22_s16, 10   ;;  %s2216_s29 = sld [smem:[#allocation9_spill]] }
 0x813   : > { %s2217_s30 = smov %s1643_s10  ;;  %s2218_s10 = smov %s1647_s11 }
 0x814   : > { %s2219_s11 = smov %s1794_s25  ;;  %s2220_s12 = smov %s1659_s14 }
 0x815   : > { %s2221_s13 = smov %s1663_s15  ;;  %21 = sbr.rel (!%p19_p10) target bundleno = 7 (0x7), region = 110 }
 0x817   : > { %s2222_s14 = smov %s2215_s21 }
 0x818   : > { %s2223_s15 = smov %s2216_s29 }
 0x81c   :  { %1249 = vsyncpa [#allocation6], 1 }
 0x81d   :  { %1251 = vsyncpa [#allocation6 + $0x1], 1 }

</bundles_post_ra>
